<compile_context>
chip_gen: v6e
topology: v6e:2x2x1
jax: 0.10.0
libtpu: 0.0.40
codegen_flags: <defaults>
</compile_context>

<pallas_src>
import jax
import jax.numpy as jnp
import numpy as np
from jax import lax
from jax.experimental import pallas as pl
from jax.experimental.pallas import tpu as pltpu


def lstm_classifier_kernel(x_ref, w_ih_ref, w_hh_ref, b_ref, w_fc_ref, b_fc_ref,
                           out_ref, h_scr, c_scr):
    tc = pl.program_id(1)
    b_blk, t_blk, _ = x_ref.shape
    hp = h_scr.shape[-1]

    # h0 = c0 = 0 (nn.LSTM default), reset at the first time chunk of every
    # batch chunk.
    @pl.when(tc == 0)
    def _():
        h_scr[...] = jnp.zeros_like(h_scr)
        c_scr[...] = jnp.zeros_like(c_scr)

    # Hoisted loads / broadcasts (weights already bf16 from the wrapper).
    w_ih = w_ih_ref[...]                                    # (D, 4*HP)  bf16
    w_hh = w_hh_ref[...]                                    # (HP, 4*HP) bf16
    bias = jnp.broadcast_to(b_ref[...], (b_blk, 4 * hp))    # (B_BLK, 4*HP) f32

    h = h_scr[...]                                          # (B_BLK, HP) f32
    c = c_scr[...]

    # Fully unrolled time loop; h/c live in vregs for the whole chunk.
    for t in range(t_blk):
        x_t = x_ref[:, t, :].astype(jnp.bfloat16)           # (B_BLK, D)
        gates = (jnp.dot(x_t, w_ih, preferred_element_type=jnp.float32)
                 + jnp.dot(h.astype(jnp.bfloat16), w_hh,
                           preferred_element_type=jnp.float32)
                 + bias)                                     # (B_BLK, 4*HP) f32
        i_g = jax.nn.sigmoid(gates[:, 0 * hp:1 * hp])        # 128-lane aligned
        f_g = jax.nn.sigmoid(gates[:, 1 * hp:2 * hp])
        g_g = jnp.tanh(gates[:, 2 * hp:3 * hp])
        o_g = jax.nn.sigmoid(gates[:, 3 * hp:4 * hp])
        c = f_g * c + i_g * g_g
        h = o_g * jnp.tanh(c)

    # Persist state across time chunks (once per chunk, not per step).
    h_scr[...] = h
    c_scr[...] = c

    # FC head on the final hidden state (== h_n[-1]).
    @pl.when(tc == pl.num_programs(1) - 1)
    def _():
        logits = (jnp.dot(h.astype(jnp.bfloat16), w_fc_ref[...],
                          preferred_element_type=jnp.float32)
                  + b_fc_ref[...])
        out_ref[...] = logits.astype(out_ref.dtype)


def _pick_time_block(T, cap=32):
    """Largest divisor of T that is <= cap (keeps the in-kernel unroll bounded)."""
    for cand in range(min(T, cap), 0, -1):
        if T % cand == 0:
            return cand
    return 1


def _pick_batch_block(B):
    """Two batch chunks (multiple of 8, so the output block stays tile-legal)
    let the 'parallel' batch axis shard across v7x's two TensorCores; otherwise
    process the whole batch in one chunk."""
    if B % 16 == 0:
        return B // 2
    return B


def lstm_classifier_forward(x, w_ih, w_hh, b_ih, b_hh, w_fc, b_fc):
    """x: [B, T, D] float32 (PyTorch batch_first). Returns logits [B, C] f32.

    Weights use PyTorch layouts: w_ih [4H, D], w_hh [4H, H], b_* [4H],
    w_fc [C, H], b_fc [C]; gate order i, f, g, o along the 4H axis.
    """
    B, T, D = x.shape
    H = w_ih.shape[0] // 4
    C = w_fc.shape[0]
    HP = ((H + 127) // 128) * 128        # lane-tile aligned hidden size

    def pad_gate_cols(w_t):              # w_t: (rows, 4H) -> (rows, 4*HP)
        rows = w_t.shape[0]
        w4 = w_t.reshape(rows, 4, H)
        w4 = jnp.pad(w4, ((0, 0), (0, 0), (0, HP - H)))
        return w4.reshape(rows, 4 * HP)

    # Pre-transposed, gate-padded, bf16 weights. Zero padding keeps the padded
    # hidden lanes exactly 0 through the whole recurrence and the FC head.
    w_ih_p = pad_gate_cols(jnp.transpose(w_ih)).astype(jnp.bfloat16)        # (D, 4HP)
    w_hh_p = pad_gate_cols(jnp.transpose(w_hh))                             # (H, 4HP)
    w_hh_p = jnp.pad(w_hh_p, ((0, HP - H), (0, 0))).astype(jnp.bfloat16)    # (HP, 4HP)
    b = jnp.pad((b_ih + b_hh).reshape(4, H), ((0, 0), (0, HP - H)))
    b = b.reshape(1, 4 * HP).astype(jnp.float32)                            # (1, 4HP)
    w_fc_p = jnp.pad(jnp.transpose(w_fc), ((0, HP - H), (0, 0)))
    w_fc_p = w_fc_p.astype(jnp.bfloat16)                                    # (HP, C)
    b_fc2 = b_fc.reshape(1, C).astype(jnp.float32)                          # (1, C)

    T_BLK = _pick_time_block(T)
    B_BLK = _pick_batch_block(B)
    grid = (B // B_BLK, T // T_BLK)

    grid_spec = pltpu.PrefetchScalarGridSpec(
        num_scalar_prefetch=0,
        grid=grid,
        in_specs=[
            pl.BlockSpec((B_BLK, T_BLK, D), lambda bi, ti: (bi, ti, 0)),  # x slab
            pl.BlockSpec((D, 4 * HP), lambda bi, ti: (0, 0)),             # w_ih
            pl.BlockSpec((HP, 4 * HP), lambda bi, ti: (0, 0)),            # w_hh
            pl.BlockSpec((1, 4 * HP), lambda bi, ti: (0, 0)),             # bias
            pl.BlockSpec((HP, C), lambda bi, ti: (0, 0)),                 # w_fc
            pl.BlockSpec((1, C), lambda bi, ti: (0, 0)),                  # b_fc
        ],
        out_specs=pl.BlockSpec((B_BLK, C), lambda bi, ti: (bi, 0)),       # logits
        scratch_shapes=[
            pltpu.VMEM((B_BLK, HP), jnp.float32),   # h state (per batch chunk)
            pltpu.VMEM((B_BLK, HP), jnp.float32),   # c state
        ],
    )

    return pl.pallas_call(
        lstm_classifier_kernel,
        out_shape=jax.ShapeDtypeStruct((B, C), jnp.float32),
        grid_spec=grid_spec,
        compiler_params=pltpu.CompilerParams(
            # batch chunks are independent (megacore on v7x); time is sequential
            dimension_semantics=("parallel", "arbitrary")),
    )(x, w_ih_p, w_hh_p, b, w_fc_p, b_fc2)


def lstm_classifier_reference(x, w_ih, w_hh, b_ih, b_hh, w_fc, b_fc):
    """Pure-JAX f32 reference matching PyTorch nn.LSTM + nn.Linear semantics."""
    B, T, D = x.shape
    H = w_hh.shape[1]

    def step(carry, x_t):
        h, c = carry
        gates = x_t @ w_ih.T + h @ w_hh.T + b_ih + b_hh
        i, f, g, o = jnp.split(gates, 4, axis=-1)
        i = jax.nn.sigmoid(i)
        f = jax.nn.sigmoid(f)
        g = jnp.tanh(g)
        o = jax.nn.sigmoid(o)
        c = f * c + i * g
        h = o * jnp.tanh(c)
        return (h, c), None

    h0 = jnp.zeros((B, H), jnp.float32)
    c0 = jnp.zeros((B, H), jnp.float32)
    (h_n, _), _ = lax.scan(step, (h0, c0), jnp.transpose(x, (1, 0, 2)))
    return h_n @ w_fc.T + b_fc


if __name__ == "__main__":
    # Small deterministic config: batch=2, seq=8, input_dim=16, hidden=32, classes=4
    B, T, D, H, C = 2, 8, 16, 32, 4

    key = jax.random.PRNGKey(0)
    kx, k1, k2, k3, k4, k5, k6 = jax.random.split(key, 7)

    # PyTorch-style init scale: U(-1/sqrt(H), 1/sqrt(H))
    s = 1.0 / np.sqrt(H)
    w_ih = jax.random.uniform(k1, (4 * H, D), jnp.float32, -s, s)
    w_hh = jax.random.uniform(k2, (4 * H, H), jnp.float32, -s, s)
    b_ih = jax.random.uniform(k3, (4 * H,), jnp.float32, -s, s)
    b_hh = jax.random.uniform(k4, (4 * H,), jnp.float32, -s, s)
    w_fc = jax.random.uniform(k5, (C, H), jnp.float32, -s, s)
    b_fc = jax.random.uniform(k6, (C,), jnp.float32, -s, s)

    x = jax.random.normal(kx, (B, T, D), jnp.float32)

    logits = lstm_classifier_forward(x, w_ih, w_hh, b_ih, b_hh, w_fc, b_fc)
    logits = jax.block_until_ready(logits)

    ref = lstm_classifier_reference(x, w_ih, w_hh, b_ih, b_hh, w_fc, b_fc)
    # bf16 MXU path with f32 accumulation: relaxed tolerance vs. f32 reference.
    np.testing.assert_allclose(np.asarray(logits), np.asarray(ref),
                               rtol=2e-2, atol=2e-2)

    print("KERNEL_OK")
</pallas_src>

<mosaic_0001>
module attributes {stable_mosaic.version = 11 : i64} {
  func.func @lstm_classifier_kernel(%arg0: i32, %arg1: i32, %arg2: memref<2x8x16xf32, #tpu.memory_space<vmem>>, %arg3: memref<16x512xbf16, #tpu.memory_space<vmem>>, %arg4: memref<128x512xbf16, #tpu.memory_space<vmem>>, %arg5: memref<1x512xf32, #tpu.memory_space<vmem>>, %arg6: memref<128x4xbf16, #tpu.memory_space<vmem>>, %arg7: memref<1x4xf32, #tpu.memory_space<vmem>>, %arg8: memref<2x4xf32, #tpu.memory_space<vmem>>, %arg9: memref<2x128xf32, #tpu.memory_space<vmem>>, %arg10: memref<2x128xf32, #tpu.memory_space<vmem>>) attributes {dimension_semantics = [#tpu.dimension_semantics<parallel>, #tpu.dimension_semantics<arbitrary>], iteration_bounds = array<i64: 1, 1>, scalar_prefetch = 0 : i64, scratch_operands = 2 : i64, tpu.core_type = #tpu.core_type<tc>, window_params = [{transform_indices = @transform_0, window_bounds = array<i64: 2, 8, 16>}, {pipeline_mode = #tpu.pipeline_mode<synchronous>, transform_indices = @transform_1, window_bounds = array<i64: 16, 512>}, {pipeline_mode = #tpu.pipeline_mode<synchronous>, transform_indices = @transform_2, window_bounds = array<i64: 128, 512>}, {pipeline_mode = #tpu.pipeline_mode<synchronous>, transform_indices = @transform_3, window_bounds = array<i64: 1, 512>}, {pipeline_mode = #tpu.pipeline_mode<synchronous>, transform_indices = @transform_4, window_bounds = array<i64: 128, 4>}, {pipeline_mode = #tpu.pipeline_mode<synchronous>, transform_indices = @transform_5, window_bounds = array<i64: 1, 4>}, {transform_indices = @transform_6, window_bounds = array<i64: 2, 4>}]} {
    %c0_i32 = arith.constant 0 : i32
    %0 = arith.cmpi eq, %arg1, %c0_i32 : i32
    %1 = arith.extui %0 : i1 to i32
    %c0_i32_0 = arith.constant 0 : i32
    %2 = arith.cmpi ne, %1, %c0_i32_0 : i32
    scf.if %2 {
      %cst_72 = arith.constant 0.000000e+00 : f32
      %279 = vector.broadcast %cst_72 : f32 to vector<2x128xf32>
      %c0_73 = arith.constant 0 : index
      %c0_74 = arith.constant 0 : index
      %280 = vector.load %arg9[%c0_73, %c0_74] : memref<2x128xf32, #tpu.memory_space<vmem>>, vector<2x128xf32>
      tpu.vector_store %arg9[%c0_73, %c0_74], %279 {strides = array<i32>} : memref<2x128xf32, #tpu.memory_space<vmem>>, vector<2x128xf32>,
      %cst_75 = arith.constant 0.000000e+00 : f32
      %281 = vector.broadcast %cst_75 : f32 to vector<2x128xf32>
      %c0_76 = arith.constant 0 : index
      %c0_77 = arith.constant 0 : index
      %282 = vector.load %arg10[%c0_76, %c0_77] : memref<2x128xf32, #tpu.memory_space<vmem>>, vector<2x128xf32>
      tpu.vector_store %arg10[%c0_76, %c0_77], %281 {strides = array<i32>} : memref<2x128xf32, #tpu.memory_space<vmem>>, vector<2x128xf32>,
    } else {
    }
    %c0 = arith.constant 0 : index
    %c0_1 = arith.constant 0 : index
    %3 = vector.load %arg3[%c0, %c0_1] : memref<16x512xbf16, #tpu.memory_space<vmem>>, vector<16x512xbf16>
    %c0_2 = arith.constant 0 : index
    %c0_3 = arith.constant 0 : index
    %4 = vector.load %arg4[%c0_2, %c0_3] : memref<128x512xbf16, #tpu.memory_space<vmem>>, vector<128x512xbf16>
    %c0_4 = arith.constant 0 : index
    %c0_5 = arith.constant 0 : index
    %5 = vector.load %arg5[%c0_4, %c0_5] : memref<1x512xf32, #tpu.memory_space<vmem>>, vector<1x512xf32>
    %6 = vector.shape_cast %5 : vector<1x512xf32> to vector<1x512xf32>
    %7 = vector.broadcast %6 : vector<1x512xf32> to vector<2x512xf32>
    %c0_6 = arith.constant 0 : index
    %c0_7 = arith.constant 0 : index
    %8 = vector.load %arg9[%c0_6, %c0_7] : memref<2x128xf32, #tpu.memory_space<vmem>>, vector<2x128xf32>
    %c0_8 = arith.constant 0 : index
    %c0_9 = arith.constant 0 : index
    %9 = vector.load %arg10[%c0_8, %c0_9] : memref<2x128xf32, #tpu.memory_space<vmem>>, vector<2x128xf32>
    %c0_10 = arith.constant 0 : index
    %c0_11 = arith.constant 0 : index
    %c0_12 = arith.constant 0 : index
    %10 = vector.load %arg2[%c0_10, %c0_11, %c0_12] : memref<2x8x16xf32, #tpu.memory_space<vmem>>, vector<2x1x16xf32>
    %11 = vector.shape_cast %10 : vector<2x1x16xf32> to vector<2x16xf32>
    %12 = arith.truncf %11 : vector<2x16xf32> to vector<2x16xbf16>
    %cst = arith.constant dense<0.000000e+00> : vector<2x512xf32>
    %13 = tpu.matmul %12, %3, %cst {dimension_numbers = #tpu.dot_dimension_numbers<[1], [0], [0], [1], [0, 0, 1, 1], [], []>} : vector<2x16xbf16>, vector<16x512xbf16>, vector<2x512xf32> -> vector<2x512xf32>
    %14 = arith.truncf %8 : vector<2x128xf32> to vector<2x128xbf16>
    %cst_13 = arith.constant dense<0.000000e+00> : vector<2x512xf32>
    %15 = tpu.matmul %14, %4, %cst_13 {dimension_numbers = #tpu.dot_dimension_numbers<[1], [0], [0], [1], [0, 0, 1, 1], [], []>} : vector<2x128xbf16>, vector<128x512xbf16>, vector<2x512xf32> -> vector<2x512xf32>
    %16 = arith.addf %13, %15 : vector<2x512xf32>
    %17 = arith.addf %16, %7 : vector<2x512xf32>
    %18 = vector.extract_strided_slice %17 {offsets = [0, 0], sizes = [2, 128], strides = [1, 1]} : vector<2x512xf32> to vector<2x128xf32>
    %19 = arith.negf %18 : vector<2x128xf32>
    %20 = math.exp %19 : vector<2x128xf32>
    %cst_14 = arith.constant 1.000000e+00 : f32
    %21 = vector.broadcast %cst_14 : f32 to vector<2x128xf32>
    %22 = arith.addf %21, %20 : vector<2x128xf32>
    %23 = arith.divf %21, %22 : vector<2x128xf32>
    %24 = vector.extract_strided_slice %17 {offsets = [0, 128], sizes = [2, 128], strides = [1, 1]} : vector<2x512xf32> to vector<2x128xf32>
    %25 = arith.negf %24 : vector<2x128xf32>
    %26 = math.exp %25 : vector<2x128xf32>
    %cst_15 = arith.constant 1.000000e+00 : f32
    %27 = vector.broadcast %cst_15 : f32 to vector<2x128xf32>
    %28 = arith.addf %27, %26 : vector<2x128xf32>
    %29 = arith.divf %27, %28 : vector<2x128xf32>
    %30 = vector.extract_strided_slice %17 {offsets = [0, 256], sizes = [2, 128], strides = [1, 1]} : vector<2x512xf32> to vector<2x128xf32>
    %31 = math.tanh %30 : vector<2x128xf32>
    %32 = vector.extract_strided_slice %17 {offsets = [0, 384], sizes = [2, 128], strides = [1, 1]} : vector<2x512xf32> to vector<2x128xf32>
    %33 = arith.negf %32 : vector<2x128xf32>
    %34 = math.exp %33 : vector<2x128xf32>
    %cst_16 = arith.constant 1.000000e+00 : f32
    %35 = vector.broadcast %cst_16 : f32 to vector<2x128xf32>
    %36 = arith.addf %35, %34 : vector<2x128xf32>
    %37 = arith.divf %35, %36 : vector<2x128xf32>
    %38 = arith.mulf %29, %9 : vector<2x128xf32>
    %39 = arith.mulf %23, %31 : vector<2x128xf32>
    %40 = arith.addf %38, %39 : vector<2x128xf32>
    %41 = math.tanh %40 : vector<2x128xf32>
    %42 = arith.mulf %37, %41 : vector<2x128xf32>
    %c0_17 = arith.constant 0 : index
    %c1 = arith.constant 1 : index
    %c0_18 = arith.constant 0 : index
    %43 = vector.load %arg2[%c0_17, %c1, %c0_18] : memref<2x8x16xf32, #tpu.memory_space<vmem>>, vector<2x1x16xf32>
    %44 = vector.shape_cast %43 : vector<2x1x16xf32> to vector<2x16xf32>
    %45 = arith.truncf %44 : vector<2x16xf32> to vector<2x16xbf16>
    %cst_19 = arith.constant dense<0.000000e+00> : vector<2x512xf32>
    %46 = tpu.matmul %45, %3, %cst_19 {dimension_numbers = #tpu.dot_dimension_numbers<[1], [0], [0], [1], [0, 0, 1, 1], [], []>} : vector<2x16xbf16>, vector<16x512xbf16>, vector<2x512xf32> -> vector<2x512xf32>
    %47 = arith.truncf %42 : vector<2x128xf32> to vector<2x128xbf16>
    %cst_20 = arith.constant dense<0.000000e+00> : vector<2x512xf32>
    %48 = tpu.matmul %47, %4, %cst_20 {dimension_numbers = #tpu.dot_dimension_numbers<[1], [0], [0], [1], [0, 0, 1, 1], [], []>} : vector<2x128xbf16>, vector<128x512xbf16>, vector<2x512xf32> -> vector<2x512xf32>
    %49 = arith.addf %46, %48 : vector<2x512xf32>
    %50 = arith.addf %49, %7 : vector<2x512xf32>
    %51 = vector.extract_strided_slice %50 {offsets = [0, 0], sizes = [2, 128], strides = [1, 1]} : vector<2x512xf32> to vector<2x128xf32>
    %52 = arith.negf %51 : vector<2x128xf32>
    %53 = math.exp %52 : vector<2x128xf32>
    %cst_21 = arith.constant 1.000000e+00 : f32
    %54 = vector.broadcast %cst_21 : f32 to vector<2x128xf32>
    %55 = arith.addf %54, %53 : vector<2x128xf32>
    %56 = arith.divf %54, %55 : vector<2x128xf32>
    %57 = vector.extract_strided_slice %50 {offsets = [0, 128], sizes = [2, 128], strides = [1, 1]} : vector<2x512xf32> to vector<2x128xf32>
    %58 = arith.negf %57 : vector<2x128xf32>
    %59 = math.exp %58 : vector<2x128xf32>
    %cst_22 = arith.constant 1.000000e+00 : f32
    %60 = vector.broadcast %cst_22 : f32 to vector<2x128xf32>
    %61 = arith.addf %60, %59 : vector<2x128xf32>
    %62 = arith.divf %60, %61 : vector<2x128xf32>
    %63 = vector.extract_strided_slice %50 {offsets = [0, 256], sizes = [2, 128], strides = [1, 1]} : vector<2x512xf32> to vector<2x128xf32>
    %64 = math.tanh %63 : vector<2x128xf32>
    %65 = vector.extract_strided_slice %50 {offsets = [0, 384], sizes = [2, 128], strides = [1, 1]} : vector<2x512xf32> to vector<2x128xf32>
    %66 = arith.negf %65 : vector<2x128xf32>
    %67 = math.exp %66 : vector<2x128xf32>
    %cst_23 = arith.constant 1.000000e+00 : f32
    %68 = vector.broadcast %cst_23 : f32 to vector<2x128xf32>
    %69 = arith.addf %68, %67 : vector<2x128xf32>
    %70 = arith.divf %68, %69 : vector<2x128xf32>
    %71 = arith.mulf %62, %40 : vector<2x128xf32>
    %72 = arith.mulf %56, %64 : vector<2x128xf32>
    %73 = arith.addf %71, %72 : vector<2x128xf32>
    %74 = math.tanh %73 : vector<2x128xf32>
    %75 = arith.mulf %70, %74 : vector<2x128xf32>
    %c0_24 = arith.constant 0 : index
    %c2 = arith.constant 2 : index
    %c0_25 = arith.constant 0 : index
    %76 = vector.load %arg2[%c0_24, %c2, %c0_25] : memref<2x8x16xf32, #tpu.memory_space<vmem>>, vector<2x1x16xf32>
    %77 = vector.shape_cast %76 : vector<2x1x16xf32> to vector<2x16xf32>
    %78 = arith.truncf %77 : vector<2x16xf32> to vector<2x16xbf16>
    %cst_26 = arith.constant dense<0.000000e+00> : vector<2x512xf32>
    %79 = tpu.matmul %78, %3, %cst_26 {dimension_numbers = #tpu.dot_dimension_numbers<[1], [0], [0], [1], [0, 0, 1, 1], [], []>} : vector<2x16xbf16>, vector<16x512xbf16>, vector<2x512xf32> -> vector<2x512xf32>
    %80 = arith.truncf %75 : vector<2x128xf32> to vector<2x128xbf16>
    %cst_27 = arith.constant dense<0.000000e+00> : vector<2x512xf32>
    %81 = tpu.matmul %80, %4, %cst_27 {dimension_numbers = #tpu.dot_dimension_numbers<[1], [0], [0], [1], [0, 0, 1, 1], [], []>} : vector<2x128xbf16>, vector<128x512xbf16>, vector<2x512xf32> -> vector<2x512xf32>
    %82 = arith.addf %79, %81 : vector<2x512xf32>
    %83 = arith.addf %82, %7 : vector<2x512xf32>
    %84 = vector.extract_strided_slice %83 {offsets = [0, 0], sizes = [2, 128], strides = [1, 1]} : vector<2x512xf32> to vector<2x128xf32>
    %85 = arith.negf %84 : vector<2x128xf32>
    %86 = math.exp %85 : vector<2x128xf32>
    %cst_28 = arith.constant 1.000000e+00 : f32
    %87 = vector.broadcast %cst_28 : f32 to vector<2x128xf32>
    %88 = arith.addf %87, %86 : vector<2x128xf32>
    %89 = arith.divf %87, %88 : vector<2x128xf32>
    %90 = vector.extract_strided_slice %83 {offsets = [0, 128], sizes = [2, 128], strides = [1, 1]} : vector<2x512xf32> to vector<2x128xf32>
    %91 = arith.negf %90 : vector<2x128xf32>
    %92 = math.exp %91 : vector<2x128xf32>
    %cst_29 = arith.constant 1.000000e+00 : f32
    %93 = vector.broadcast %cst_29 : f32 to vector<2x128xf32>
    %94 = arith.addf %93, %92 : vector<2x128xf32>
    %95 = arith.divf %93, %94 : vector<2x128xf32>
    %96 = vector.extract_strided_slice %83 {offsets = [0, 256], sizes = [2, 128], strides = [1, 1]} : vector<2x512xf32> to vector<2x128xf32>
    %97 = math.tanh %96 : vector<2x128xf32>
    %98 = vector.extract_strided_slice %83 {offsets = [0, 384], sizes = [2, 128], strides = [1, 1]} : vector<2x512xf32> to vector<2x128xf32>
    %99 = arith.negf %98 : vector<2x128xf32>
    %100 = math.exp %99 : vector<2x128xf32>
    %cst_30 = arith.constant 1.000000e+00 : f32
    %101 = vector.broadcast %cst_30 : f32 to vector<2x128xf32>
    %102 = arith.addf %101, %100 : vector<2x128xf32>
    %103 = arith.divf %101, %102 : vector<2x128xf32>
    %104 = arith.mulf %95, %73 : vector<2x128xf32>
    %105 = arith.mulf %89, %97 : vector<2x128xf32>
    %106 = arith.addf %104, %105 : vector<2x128xf32>
    %107 = math.tanh %106 : vector<2x128xf32>
    %108 = arith.mulf %103, %107 : vector<2x128xf32>
    %c0_31 = arith.constant 0 : index
    %c3 = arith.constant 3 : index
    %c0_32 = arith.constant 0 : index
    %109 = vector.load %arg2[%c0_31, %c3, %c0_32] : memref<2x8x16xf32, #tpu.memory_space<vmem>>, vector<2x1x16xf32>
    %110 = vector.shape_cast %109 : vector<2x1x16xf32> to vector<2x16xf32>
    %111 = arith.truncf %110 : vector<2x16xf32> to vector<2x16xbf16>
    %cst_33 = arith.constant dense<0.000000e+00> : vector<2x512xf32>
    %112 = tpu.matmul %111, %3, %cst_33 {dimension_numbers = #tpu.dot_dimension_numbers<[1], [0], [0], [1], [0, 0, 1, 1], [], []>} : vector<2x16xbf16>, vector<16x512xbf16>, vector<2x512xf32> -> vector<2x512xf32>
    %113 = arith.truncf %108 : vector<2x128xf32> to vector<2x128xbf16>
    %cst_34 = arith.constant dense<0.000000e+00> : vector<2x512xf32>
    %114 = tpu.matmul %113, %4, %cst_34 {dimension_numbers = #tpu.dot_dimension_numbers<[1], [0], [0], [1], [0, 0, 1, 1], [], []>} : vector<2x128xbf16>, vector<128x512xbf16>, vector<2x512xf32> -> vector<2x512xf32>
    %115 = arith.addf %112, %114 : vector<2x512xf32>
    %116 = arith.addf %115, %7 : vector<2x512xf32>
    %117 = vector.extract_strided_slice %116 {offsets = [0, 0], sizes = [2, 128], strides = [1, 1]} : vector<2x512xf32> to vector<2x128xf32>
    %118 = arith.negf %117 : vector<2x128xf32>
    %119 = math.exp %118 : vector<2x128xf32>
    %cst_35 = arith.constant 1.000000e+00 : f32
    %120 = vector.broadcast %cst_35 : f32 to vector<2x128xf32>
    %121 = arith.addf %120, %119 : vector<2x128xf32>
    %122 = arith.divf %120, %121 : vector<2x128xf32>
    %123 = vector.extract_strided_slice %116 {offsets = [0, 128], sizes = [2, 128], strides = [1, 1]} : vector<2x512xf32> to vector<2x128xf32>
    %124 = arith.negf %123 : vector<2x128xf32>
    %125 = math.exp %124 : vector<2x128xf32>
    %cst_36 = arith.constant 1.000000e+00 : f32
    %126 = vector.broadcast %cst_36 : f32 to vector<2x128xf32>
    %127 = arith.addf %126, %125 : vector<2x128xf32>
    %128 = arith.divf %126, %127 : vector<2x128xf32>
    %129 = vector.extract_strided_slice %116 {offsets = [0, 256], sizes = [2, 128], strides = [1, 1]} : vector<2x512xf32> to vector<2x128xf32>
    %130 = math.tanh %129 : vector<2x128xf32>
    %131 = vector.extract_strided_slice %116 {offsets = [0, 384], sizes = [2, 128], strides = [1, 1]} : vector<2x512xf32> to vector<2x128xf32>
    %132 = arith.negf %131 : vector<2x128xf32>
    %133 = math.exp %132 : vector<2x128xf32>
    %cst_37 = arith.constant 1.000000e+00 : f32
    %134 = vector.broadcast %cst_37 : f32 to vector<2x128xf32>
    %135 = arith.addf %134, %133 : vector<2x128xf32>
    %136 = arith.divf %134, %135 : vector<2x128xf32>
    %137 = arith.mulf %128, %106 : vector<2x128xf32>
    %138 = arith.mulf %122, %130 : vector<2x128xf32>
    %139 = arith.addf %137, %138 : vector<2x128xf32>
    %140 = math.tanh %139 : vector<2x128xf32>
    %141 = arith.mulf %136, %140 : vector<2x128xf32>
    %c0_38 = arith.constant 0 : index
    %c4 = arith.constant 4 : index
    %c0_39 = arith.constant 0 : index
    %142 = vector.load %arg2[%c0_38, %c4, %c0_39] : memref<2x8x16xf32, #tpu.memory_space<vmem>>, vector<2x1x16xf32>
    %143 = vector.shape_cast %142 : vector<2x1x16xf32> to vector<2x16xf32>
    %144 = arith.truncf %143 : vector<2x16xf32> to vector<2x16xbf16>
    %cst_40 = arith.constant dense<0.000000e+00> : vector<2x512xf32>
    %145 = tpu.matmul %144, %3, %cst_40 {dimension_numbers = #tpu.dot_dimension_numbers<[1], [0], [0], [1], [0, 0, 1, 1], [], []>} : vector<2x16xbf16>, vector<16x512xbf16>, vector<2x512xf32> -> vector<2x512xf32>
    %146 = arith.truncf %141 : vector<2x128xf32> to vector<2x128xbf16>
    %cst_41 = arith.constant dense<0.000000e+00> : vector<2x512xf32>
    %147 = tpu.matmul %146, %4, %cst_41 {dimension_numbers = #tpu.dot_dimension_numbers<[1], [0], [0], [1], [0, 0, 1, 1], [], []>} : vector<2x128xbf16>, vector<128x512xbf16>, vector<2x512xf32> -> vector<2x512xf32>
    %148 = arith.addf %145, %147 : vector<2x512xf32>
    %149 = arith.addf %148, %7 : vector<2x512xf32>
    %150 = vector.extract_strided_slice %149 {offsets = [0, 0], sizes = [2, 128], strides = [1, 1]} : vector<2x512xf32> to vector<2x128xf32>
    %151 = arith.negf %150 : vector<2x128xf32>
    %152 = math.exp %151 : vector<2x128xf32>
    %cst_42 = arith.constant 1.000000e+00 : f32
    %153 = vector.broadcast %cst_42 : f32 to vector<2x128xf32>
    %154 = arith.addf %153, %152 : vector<2x128xf32>
    %155 = arith.divf %153, %154 : vector<2x128xf32>
    %156 = vector.extract_strided_slice %149 {offsets = [0, 128], sizes = [2, 128], strides = [1, 1]} : vector<2x512xf32> to vector<2x128xf32>
    %157 = arith.negf %156 : vector<2x128xf32>
    %158 = math.exp %157 : vector<2x128xf32>
    %cst_43 = arith.constant 1.000000e+00 : f32
    %159 = vector.broadcast %cst_43 : f32 to vector<2x128xf32>
    %160 = arith.addf %159, %158 : vector<2x128xf32>
    %161 = arith.divf %159, %160 : vector<2x128xf32>
    %162 = vector.extract_strided_slice %149 {offsets = [0, 256], sizes = [2, 128], strides = [1, 1]} : vector<2x512xf32> to vector<2x128xf32>
    %163 = math.tanh %162 : vector<2x128xf32>
    %164 = vector.extract_strided_slice %149 {offsets = [0, 384], sizes = [2, 128], strides = [1, 1]} : vector<2x512xf32> to vector<2x128xf32>
    %165 = arith.negf %164 : vector<2x128xf32>
    %166 = math.exp %165 : vector<2x128xf32>
    %cst_44 = arith.constant 1.000000e+00 : f32
    %167 = vector.broadcast %cst_44 : f32 to vector<2x128xf32>
    %168 = arith.addf %167, %166 : vector<2x128xf32>
    %169 = arith.divf %167, %168 : vector<2x128xf32>
    %170 = arith.mulf %161, %139 : vector<2x128xf32>
    %171 = arith.mulf %155, %163 : vector<2x128xf32>
    %172 = arith.addf %170, %171 : vector<2x128xf32>
    %173 = math.tanh %172 : vector<2x128xf32>
    %174 = arith.mulf %169, %173 : vector<2x128xf32>
    %c0_45 = arith.constant 0 : index
    %c5 = arith.constant 5 : index
    %c0_46 = arith.constant 0 : index
    %175 = vector.load %arg2[%c0_45, %c5, %c0_46] : memref<2x8x16xf32, #tpu.memory_space<vmem>>, vector<2x1x16xf32>
    %176 = vector.shape_cast %175 : vector<2x1x16xf32> to vector<2x16xf32>
    %177 = arith.truncf %176 : vector<2x16xf32> to vector<2x16xbf16>
    %cst_47 = arith.constant dense<0.000000e+00> : vector<2x512xf32>
    %178 = tpu.matmul %177, %3, %cst_47 {dimension_numbers = #tpu.dot_dimension_numbers<[1], [0], [0], [1], [0, 0, 1, 1], [], []>} : vector<2x16xbf16>, vector<16x512xbf16>, vector<2x512xf32> -> vector<2x512xf32>
    %179 = arith.truncf %174 : vector<2x128xf32> to vector<2x128xbf16>
    %cst_48 = arith.constant dense<0.000000e+00> : vector<2x512xf32>
    %180 = tpu.matmul %179, %4, %cst_48 {dimension_numbers = #tpu.dot_dimension_numbers<[1], [0], [0], [1], [0, 0, 1, 1], [], []>} : vector<2x128xbf16>, vector<128x512xbf16>, vector<2x512xf32> -> vector<2x512xf32>
    %181 = arith.addf %178, %180 : vector<2x512xf32>
    %182 = arith.addf %181, %7 : vector<2x512xf32>
    %183 = vector.extract_strided_slice %182 {offsets = [0, 0], sizes = [2, 128], strides = [1, 1]} : vector<2x512xf32> to vector<2x128xf32>
    %184 = arith.negf %183 : vector<2x128xf32>
    %185 = math.exp %184 : vector<2x128xf32>
    %cst_49 = arith.constant 1.000000e+00 : f32
    %186 = vector.broadcast %cst_49 : f32 to vector<2x128xf32>
    %187 = arith.addf %186, %185 : vector<2x128xf32>
    %188 = arith.divf %186, %187 : vector<2x128xf32>
    %189 = vector.extract_strided_slice %182 {offsets = [0, 128], sizes = [2, 128], strides = [1, 1]} : vector<2x512xf32> to vector<2x128xf32>
    %190 = arith.negf %189 : vector<2x128xf32>
    %191 = math.exp %190 : vector<2x128xf32>
    %cst_50 = arith.constant 1.000000e+00 : f32
    %192 = vector.broadcast %cst_50 : f32 to vector<2x128xf32>
    %193 = arith.addf %192, %191 : vector<2x128xf32>
    %194 = arith.divf %192, %193 : vector<2x128xf32>
    %195 = vector.extract_strided_slice %182 {offsets = [0, 256], sizes = [2, 128], strides = [1, 1]} : vector<2x512xf32> to vector<2x128xf32>
    %196 = math.tanh %195 : vector<2x128xf32>
    %197 = vector.extract_strided_slice %182 {offsets = [0, 384], sizes = [2, 128], strides = [1, 1]} : vector<2x512xf32> to vector<2x128xf32>
    %198 = arith.negf %197 : vector<2x128xf32>
    %199 = math.exp %198 : vector<2x128xf32>
    %cst_51 = arith.constant 1.000000e+00 : f32
    %200 = vector.broadcast %cst_51 : f32 to vector<2x128xf32>
    %201 = arith.addf %200, %199 : vector<2x128xf32>
    %202 = arith.divf %200, %201 : vector<2x128xf32>
    %203 = arith.mulf %194, %172 : vector<2x128xf32>
    %204 = arith.mulf %188, %196 : vector<2x128xf32>
    %205 = arith.addf %203, %204 : vector<2x128xf32>
    %206 = math.tanh %205 : vector<2x128xf32>
    %207 = arith.mulf %202, %206 : vector<2x128xf32>
    %c0_52 = arith.constant 0 : index
    %c6 = arith.constant 6 : index
    %c0_53 = arith.constant 0 : index
    %208 = vector.load %arg2[%c0_52, %c6, %c0_53] : memref<2x8x16xf32, #tpu.memory_space<vmem>>, vector<2x1x16xf32>
    %209 = vector.shape_cast %208 : vector<2x1x16xf32> to vector<2x16xf32>
    %210 = arith.truncf %209 : vector<2x16xf32> to vector<2x16xbf16>
    %cst_54 = arith.constant dense<0.000000e+00> : vector<2x512xf32>
    %211 = tpu.matmul %210, %3, %cst_54 {dimension_numbers = #tpu.dot_dimension_numbers<[1], [0], [0], [1], [0, 0, 1, 1], [], []>} : vector<2x16xbf16>, vector<16x512xbf16>, vector<2x512xf32> -> vector<2x512xf32>
    %212 = arith.truncf %207 : vector<2x128xf32> to vector<2x128xbf16>
    %cst_55 = arith.constant dense<0.000000e+00> : vector<2x512xf32>
    %213 = tpu.matmul %212, %4, %cst_55 {dimension_numbers = #tpu.dot_dimension_numbers<[1], [0], [0], [1], [0, 0, 1, 1], [], []>} : vector<2x128xbf16>, vector<128x512xbf16>, vector<2x512xf32> -> vector<2x512xf32>
    %214 = arith.addf %211, %213 : vector<2x512xf32>
    %215 = arith.addf %214, %7 : vector<2x512xf32>
    %216 = vector.extract_strided_slice %215 {offsets = [0, 0], sizes = [2, 128], strides = [1, 1]} : vector<2x512xf32> to vector<2x128xf32>
    %217 = arith.negf %216 : vector<2x128xf32>
    %218 = math.exp %217 : vector<2x128xf32>
    %cst_56 = arith.constant 1.000000e+00 : f32
    %219 = vector.broadcast %cst_56 : f32 to vector<2x128xf32>
    %220 = arith.addf %219, %218 : vector<2x128xf32>
    %221 = arith.divf %219, %220 : vector<2x128xf32>
    %222 = vector.extract_strided_slice %215 {offsets = [0, 128], sizes = [2, 128], strides = [1, 1]} : vector<2x512xf32> to vector<2x128xf32>
    %223 = arith.negf %222 : vector<2x128xf32>
    %224 = math.exp %223 : vector<2x128xf32>
    %cst_57 = arith.constant 1.000000e+00 : f32
    %225 = vector.broadcast %cst_57 : f32 to vector<2x128xf32>
    %226 = arith.addf %225, %224 : vector<2x128xf32>
    %227 = arith.divf %225, %226 : vector<2x128xf32>
    %228 = vector.extract_strided_slice %215 {offsets = [0, 256], sizes = [2, 128], strides = [1, 1]} : vector<2x512xf32> to vector<2x128xf32>
    %229 = math.tanh %228 : vector<2x128xf32>
    %230 = vector.extract_strided_slice %215 {offsets = [0, 384], sizes = [2, 128], strides = [1, 1]} : vector<2x512xf32> to vector<2x128xf32>
    %231 = arith.negf %230 : vector<2x128xf32>
    %232 = math.exp %231 : vector<2x128xf32>
    %cst_58 = arith.constant 1.000000e+00 : f32
    %233 = vector.broadcast %cst_58 : f32 to vector<2x128xf32>
    %234 = arith.addf %233, %232 : vector<2x128xf32>
    %235 = arith.divf %233, %234 : vector<2x128xf32>
    %236 = arith.mulf %227, %205 : vector<2x128xf32>
    %237 = arith.mulf %221, %229 : vector<2x128xf32>
    %238 = arith.addf %236, %237 : vector<2x128xf32>
    %239 = math.tanh %238 : vector<2x128xf32>
    %240 = arith.mulf %235, %239 : vector<2x128xf32>
    %c0_59 = arith.constant 0 : index
    %c7 = arith.constant 7 : index
    %c0_60 = arith.constant 0 : index
    %241 = vector.load %arg2[%c0_59, %c7, %c0_60] : memref<2x8x16xf32, #tpu.memory_space<vmem>>, vector<2x1x16xf32>
    %242 = vector.shape_cast %241 : vector<2x1x16xf32> to vector<2x16xf32>
    %243 = arith.truncf %242 : vector<2x16xf32> to vector<2x16xbf16>
    %cst_61 = arith.constant dense<0.000000e+00> : vector<2x512xf32>
    %244 = tpu.matmul %243, %3, %cst_61 {dimension_numbers = #tpu.dot_dimension_numbers<[1], [0], [0], [1], [0, 0, 1, 1], [], []>} : vector<2x16xbf16>, vector<16x512xbf16>, vector<2x512xf32> -> vector<2x512xf32>
    %245 = arith.truncf %240 : vector<2x128xf32> to vector<2x128xbf16>
    %cst_62 = arith.constant dense<0.000000e+00> : vector<2x512xf32>
    %246 = tpu.matmul %245, %4, %cst_62 {dimension_numbers = #tpu.dot_dimension_numbers<[1], [0], [0], [1], [0, 0, 1, 1], [], []>} : vector<2x128xbf16>, vector<128x512xbf16>, vector<2x512xf32> -> vector<2x512xf32>
    %247 = arith.addf %244, %246 : vector<2x512xf32>
    %248 = arith.addf %247, %7 : vector<2x512xf32>
    %249 = vector.extract_strided_slice %248 {offsets = [0, 0], sizes = [2, 128], strides = [1, 1]} : vector<2x512xf32> to vector<2x128xf32>
    %250 = arith.negf %249 : vector<2x128xf32>
    %251 = math.exp %250 : vector<2x128xf32>
    %cst_63 = arith.constant 1.000000e+00 : f32
    %252 = vector.broadcast %cst_63 : f32 to vector<2x128xf32>
    %253 = arith.addf %252, %251 : vector<2x128xf32>
    %254 = arith.divf %252, %253 : vector<2x128xf32>
    %255 = vector.extract_strided_slice %248 {offsets = [0, 128], sizes = [2, 128], strides = [1, 1]} : vector<2x512xf32> to vector<2x128xf32>
    %256 = arith.negf %255 : vector<2x128xf32>
    %257 = math.exp %256 : vector<2x128xf32>
    %cst_64 = arith.constant 1.000000e+00 : f32
    %258 = vector.broadcast %cst_64 : f32 to vector<2x128xf32>
    %259 = arith.addf %258, %257 : vector<2x128xf32>
    %260 = arith.divf %258, %259 : vector<2x128xf32>
    %261 = vector.extract_strided_slice %248 {offsets = [0, 256], sizes = [2, 128], strides = [1, 1]} : vector<2x512xf32> to vector<2x128xf32>
    %262 = math.tanh %261 : vector<2x128xf32>
    %263 = vector.extract_strided_slice %248 {offsets = [0, 384], sizes = [2, 128], strides = [1, 1]} : vector<2x512xf32> to vector<2x128xf32>
    %264 = arith.negf %263 : vector<2x128xf32>
    %265 = math.exp %264 : vector<2x128xf32>
    %cst_65 = arith.constant 1.000000e+00 : f32
    %266 = vector.broadcast %cst_65 : f32 to vector<2x128xf32>
    %267 = arith.addf %266, %265 : vector<2x128xf32>
    %268 = arith.divf %266, %267 : vector<2x128xf32>
    %269 = arith.mulf %260, %238 : vector<2x128xf32>
    %270 = arith.mulf %254, %262 : vector<2x128xf32>
    %271 = arith.addf %269, %270 : vector<2x128xf32>
    %272 = math.tanh %271 : vector<2x128xf32>
    %273 = arith.mulf %268, %272 : vector<2x128xf32>
    %c0_66 = arith.constant 0 : index
    %c0_67 = arith.constant 0 : index
    %274 = vector.load %arg9[%c0_66, %c0_67] : memref<2x128xf32, #tpu.memory_space<vmem>>, vector<2x128xf32>
    tpu.vector_store %arg9[%c0_66, %c0_67], %273 {strides = array<i32>} : memref<2x128xf32, #tpu.memory_space<vmem>>, vector<2x128xf32>,
    %c0_68 = arith.constant 0 : index
    %c0_69 = arith.constant 0 : index
    %275 = vector.load %arg10[%c0_68, %c0_69] : memref<2x128xf32, #tpu.memory_space<vmem>>, vector<2x128xf32>
    tpu.vector_store %arg10[%c0_68, %c0_69], %271 {strides = array<i32>} : memref<2x128xf32, #tpu.memory_space<vmem>>, vector<2x128xf32>,
    %c0_i32_70 = arith.constant 0 : i32
    %276 = arith.cmpi eq, %arg1, %c0_i32_70 : i32
    %277 = arith.extui %276 : i1 to i32
    %c0_i32_71 = arith.constant 0 : i32
    %278 = arith.cmpi ne, %277, %c0_i32_71 : i32
    scf.if %278 {
      %279 = arith.truncf %273 : vector<2x128xf32> to vector<2x128xbf16>
      %c0_72 = arith.constant 0 : index
      %c0_73 = arith.constant 0 : index
      %280 = vector.load %arg6[%c0_72, %c0_73] : memref<128x4xbf16, #tpu.memory_space<vmem>>, vector<128x4xbf16>
      %cst_74 = arith.constant dense<0.000000e+00> : vector<2x4xf32>
      %281 = tpu.matmul %279, %280, %cst_74 {dimension_numbers = #tpu.dot_dimension_numbers<[1], [0], [0], [1], [0, 0, 1, 1], [], []>} : vector<2x128xbf16>, vector<128x4xbf16>, vector<2x4xf32> -> vector<2x4xf32>
      %c0_75 = arith.constant 0 : index
      %c0_76 = arith.constant 0 : index
      %282 = vector.load %arg7[%c0_75, %c0_76] : memref<1x4xf32, #tpu.memory_space<vmem>>, vector<1x4xf32>
      %283 = vector.broadcast %282 : vector<1x4xf32> to vector<2x4xf32>
      %284 = arith.addf %281, %283 : vector<2x4xf32>
      %c0_77 = arith.constant 0 : index
      %c0_78 = arith.constant 0 : index
      %285 = vector.load %arg8[%c0_77, %c0_78] : memref<2x4xf32, #tpu.memory_space<vmem>>, vector<2x4xf32>
      tpu.vector_store %arg8[%c0_77, %c0_78], %284 {strides = array<i32>} : memref<2x4xf32, #tpu.memory_space<vmem>>, vector<2x4xf32>,
    } else {
    }
    return
  }
  func.func @transform_0(%arg0: i32, %arg1: i32) -> (i32, i32, i32) {
    %c0_i32 = arith.constant 0 : i32
    %c0_i32_0 = arith.constant 0 : i32
    return %arg0, %arg1, %c0_i32 : i32, i32, i32
  }
  func.func @transform_1(%arg0: i32, %arg1: i32) -> (i32, i32) {
    %c0_i32 = arith.constant 0 : i32
    %c0_i32_0 = arith.constant 0 : i32
    %c0_i32_1 = arith.constant 0 : i32
    return %c0_i32, %c0_i32_0 : i32, i32
  }
  func.func @transform_2(%arg0: i32, %arg1: i32) -> (i32, i32) {
    %c0_i32 = arith.constant 0 : i32
    %c0_i32_0 = arith.constant 0 : i32
    %c0_i32_1 = arith.constant 0 : i32
    return %c0_i32, %c0_i32_0 : i32, i32
  }
  func.func @transform_3(%arg0: i32, %arg1: i32) -> (i32, i32) {
    %c0_i32 = arith.constant 0 : i32
    %c0_i32_0 = arith.constant 0 : i32
    %c0_i32_1 = arith.constant 0 : i32
    return %c0_i32, %c0_i32_0 : i32, i32
  }
  func.func @transform_4(%arg0: i32, %arg1: i32) -> (i32, i32) {
    %c0_i32 = arith.constant 0 : i32
    %c0_i32_0 = arith.constant 0 : i32
    %c0_i32_1 = arith.constant 0 : i32
    return %c0_i32, %c0_i32_0 : i32, i32
  }
  func.func @transform_5(%arg0: i32, %arg1: i32) -> (i32, i32) {
    %c0_i32 = arith.constant 0 : i32
    %c0_i32_0 = arith.constant 0 : i32
    %c0_i32_1 = arith.constant 0 : i32
    return %c0_i32, %c0_i32_0 : i32, i32
  }
  func.func @transform_6(%arg0: i32, %arg1: i32) -> (i32, i32) {
    %c0_i32 = arith.constant 0 : i32
    %c0_i32_0 = arith.constant 0 : i32
    return %arg0, %c0_i32 : i32, i32
  }
}

</mosaic_0001>

<bundles_post_ra>
// kernel: tpu_custom_call.1
= control target key start
LH: loop header
LB: loop body
LE: loop exit
PB: predicated region body
PF: predicated region fallthrough
CT: control target
= control target key end

     0   :  { %11 = vsyncpa [#allocation5], 0  ;;  %s3185_s0 = inlined_call_operand.vmem [shape: f32[2,8,16], index: 0, kind: input, shape index: {}]   ;;  %s3186_s1 = inlined_call_operand.vmem [shape: bf16[16,512], index: 1, kind: input, shape index: {}]   ;;  %s3187_s2 = inlined_call_operand.hbm [shape: bf16[128,512], index: 2, kind: input, shape index: {}]   ;;  %s3188_s3 = inlined_call_operand.vmem [shape: f32[1,512], index: 3, kind: input, shape index: {}]   ;;  %s3189_s4 = inlined_call_operand.vmem [shape: bf16[128,4], index: 4, kind: input, shape index: {}]   ;;  %s3190_s5 = inlined_call_operand.vmem [shape: f32[1,4], index: 5, kind: input, shape index: {}]   ;;  %s3191_s6 = inlined_call_operand.hbm [shape: f32[2,4], index: 6, kind: output, shape index: {}]  }
   0x1   :  { %12 = vsyncpa [#allocation6], 0  ;;  %s2468_s21 = smov [#allocation4]  }
   0x2   :  { %s22_s22 = sshll.u32 %s2468_s21, 4  ;;  %s23_s22 = int_to_ptr.vmem [resolvable:$true] %s22_s22 }
   0x3   :  { %s2432_s23 = scalar_lea.vmem %s23_s22, 4096  ;;  %p2437_p1 = scmp.lt.s32.totalorder %s23_s22, %s23_s22 }
   0x4   :  { %p2433_p0 = scmp.ne.s32.totalorder %s23_s22, %s2432_s23  ;;  %p2438_p2 = scmp.lt.s32.totalorder %s2432_s23, %s2432_s23 }
   0x6   :  { %p2439_p3 = por %p2438_p2, %p2437_p1 }
   0x8   :  { %p2440_p4 = pnand %p2439_p3, %p2433_p0 }
   0xa   :  { %2443 = shalt.err (!%p2440_p4)
}
   0xb   :  { %s2469_s24 = smov 256   ;;  %s2470_s25 = smov 16  }
   0xc   :  { %28 = dma.hbm_to_vmem [thread:$0]  %s3187_s2, 4096, %s23_s22, [#allocation5], %s2469_s24, %s2469_s24, %s2470_s25  }
   0xd   :  { %2464 = dma.done.wait [#allocation5], 4096  }
   0xe   :  { %2465 = vsyncadd [#allocation5], 4294963200  ;;  %v2471_v0 = vmov 0   ;;  %v3192_v1 = vmov 0.0   ;;  %v2517_v2 = vld [vmem:[#allocation4 + $0xec] ss:$16 sps:$4 sm:$0xff]   ;;  %v83_v49 = vlaneseq }
   0xf   :  { %343 = vmatprep.mubr.bf16.mxu1 %v2471_v0  ;;  %43 = vst [vmem:[#allocation2] sm:$0x3] %v3192_v1  ;;  %44 = vst [vmem:[#allocation3] sm:$0x3] %v3192_v1  ;;  %302 = vmatprep.mubr.bf16.mxu0 %v2471_v0  ;;  %v2519_v3 = vld [vmem:[#allocation4 + $0xe8] ss:$16 sps:$4 sm:$0xff]  }
  0x10   :  { %311 = vmatprep.subr.bf16.mxu1 %v2517_v2  ;;  %v2522_v4 = vld [vmem:[#allocation4 + $0xe4] ss:$16 sps:$4 sm:$0xff]   ;;  %v2524_v5 = vld [vmem:[#allocation4 + $0xe0] ss:$16 sps:$4 sm:$0xff]   ;;  %v2527_v6 = vld [vmem:[#allocation4 + $0xcc] ss:$16 sps:$4 sm:$0xff]  }
  0x11   :  { %312 = vmatpush1.bf16.msra.mxu1 %v2519_v3  ;;  %v2529_v7 = vld [vmem:[#allocation4 + $0xc8] ss:$16 sps:$4 sm:$0xff]   ;;  %270 = vmatprep.subr.bf16.mxu0 %v2522_v4  ;;  %v2532_v8 = vld [vmem:[#allocation4 + $0xc4] ss:$16 sps:$4 sm:$0xff]   ;;  %v2536_v9 = vld [vmem:[#allocation4 + $0xc0] ss:$16 sps:$4 sm:$0xff]  }
  0x12   :  { %271 = vmatpush1.bf16.msra.mxu0 %v2524_v5  ;;  %313 = vmatprep.subr.bf16.mxu1 %v2527_v6  ;;  %v2539_v10 = vld [vmem:[#allocation4 + $0xac] ss:$16 sps:$4 sm:$0xff]   ;;  %v2542_v11 = vld [vmem:[#allocation4 + $0xa8] ss:$16 sps:$4 sm:$0xff]   ;;  %v2544_v12 = vld [vmem:[#allocation4 + $0xa4] ss:$16 sps:$4 sm:$0xff]  }
  0x13   :  { %272 = vmatprep.subr.bf16.mxu0 %v2532_v8  ;;  %v2547_v13 = vld [vmem:[#allocation4 + $0x8c] ss:$16 sps:$4 sm:$0xff]   ;;  %v2550_v14 = vld [vmem:[#allocation4 + $0xa0] ss:$16 sps:$4 sm:$0xff]   ;;  %v2553_v15 = vld [vmem:[#allocation4 + $0x84] ss:$16 sps:$4 sm:$0xff]  }
  0x14   :  { %v2556_v16 = vld [vmem:[#allocation4 + $0x88] ss:$16 sps:$4 sm:$0xff]   ;;  %v2559_v17 = vld [vmem:[#allocation4 + $0x6c] ss:$16 sps:$4 sm:$0xff]   ;;  %v2562_v18 = vld [vmem:[#allocation4 + $0x80] ss:$16 sps:$4 sm:$0xff]  }
  0x15   :  { %314 = vmatpush1.bf16.msra.mxu1 %v2529_v7  ;;  %v2565_v19 = vld [vmem:[#allocation4 + $0x64] ss:$16 sps:$4 sm:$0xff]   ;;  %v2568_v20 = vld [vmem:[#allocation4 + $0x68] ss:$16 sps:$4 sm:$0xff]   ;;  %v2571_v21 = vld [vmem:[#allocation4 + $0x4c] ss:$16 sps:$4 sm:$0xff]  }
  0x16   :  { %315 = vmatprep.subr.bf16.mxu1 %v2539_v10  ;;  %273 = vmatpush1.bf16.msra.mxu0 %v2536_v9  ;;  %v2574_v22 = vld [vmem:[#allocation4 + $0x60] ss:$16 sps:$4 sm:$0xff]   ;;  %v2577_v23 = vld [vmem:[#allocation4 + $0x44] ss:$16 sps:$4 sm:$0xff]   ;;  %v2580_v24 = vld [vmem:[#allocation4 + $0x48] ss:$16 sps:$4 sm:$0xff]  }
  0x17   :  { %274 = vmatprep.subr.bf16.mxu0 %v2544_v12  ;;  %v2583_v25 = vld [vmem:[#allocation4 + $0x2c] ss:$16 sps:$4 sm:$0xff]   ;;  %v2586_v26 = vld [vmem:[#allocation4 + $0x40] ss:$16 sps:$4 sm:$0xff]   ;;  %v2589_v27 = vld [vmem:[#allocation4 + $0x28] ss:$16 sps:$4 sm:$0xff]  }
  0x18   :  { %v2591_v28 = vld [vmem:[#allocation4 + $0x24] ss:$16 sps:$4 sm:$0xff]   ;;  %v2594_v29 = vld [vmem:[#allocation4 + $0x20] ss:$16 sps:$4 sm:$0xff]   ;;  %v2596_v30 = vld [vmem:[#allocation4 + $0xc] ss:$16 sps:$4 sm:$0xff]  }
  0x19   :  { %316 = vmatpush1.bf16.msra.mxu1 %v2542_v11  ;;  %v106_v31 = vld [vmem:[%s3185_s0 + $0x8] sm:$0x1]  ;;  %v105_v33 = vld [vmem:[%s3185_s0] sm:$0x1]  ;;  %v2608_v35 = vld [vmem:[#allocation4 + $0x8] ss:$16 sps:$4 sm:$0xff]  }
  0x1a   :  { %317 = vmatprep.subr.bf16.mxu1 %v2547_v13  ;;  %275 = vmatpush1.bf16.msra.mxu0 %v2550_v14  ;;  %v2602_v32 = vld [vmem:[#allocation4 + $0x4] ss:$16 sps:$4 sm:$0xff]   ;;  %v108_v34 = vpack.c.bf16 %v106_v31, %v106_v31  ;;  %v103_v36 = vld [vmem:[#allocation2] sm:$0x3]  ;;  %v2612_v37 = vld [vmem:[#allocation4] ss:$16 sps:$4 sm:$0xff]   ;;  %v107_v38 = vpack.c.bf16 %v105_v33, %v105_v33 }
  0x1b   :  { %276 = vmatprep.subr.bf16.mxu0 %v2553_v15  ;;  %v2618_v40 = vld [vmem:[%s3186_s1 + $0x4] ss:$16 sps:$4 sm:$0xff]   ;;  %v109_v41 = vpack.c.bf16 %v103_v36, %v103_v36  ;;  %v2626_v42 = vld [vmem:[%s3186_s1] ss:$16 sps:$4 sm:$0xff]   ;;  %vm357_vm0 = vcmask 1041409   ;;  %vm380_vm1 = vcmask 130048  }
  0x1c   :  { %v355_v39 = vunpack.c.l.b16 %v108_v34  ;;  %v354_v43 = vunpack.c.l.b16 %v107_v38  ;;  %v2632_v45 = vld [vmem:[%s3186_s1 + $0xc] ss:$16 sps:$4 sm:$0xff]   ;;  %v2646_v48 = vld [vmem:[%s3186_s1 + $0x8] ss:$16 sps:$4 sm:$0xff]   ;;  %v84_v50 = vshrl.u32 %v83_v49, 7  ;;  %vm2473_vm2 = vmmov 0  }
  0x1d   :  { %318 = vmatpush1.bf16.msra.mxu1 %v2556_v16  ;;  %v81_v57 = vld [vmem:[%s3188_s3] sm:$0xf]  ;;  %s2474_s16 = smov [#allocation7]   ;;  %vm2060_vm3 = vcmask 25600  }
  0x1e   :  { %319 = vmatprep.subr.bf16.mxu1 %v2559_v17  ;;  %277 = vmatpush1.bf16.msra.mxu0 %v2562_v18  ;;  %v356_v44 = vrot.slane %v355_v39, 7  ;;  %v85_v54 = vsub.s32 0, %v84_v50  ;;  %v89_v58 = vsub.s32 1, %v84_v50  ;;  %s2068_s3 = sshll.u32 %s2474_s16, 4  ;;  %s2069_s3 = int_to_ptr.vmem [resolvable:$true] %s2068_s3 }
  0x1f   :  { %278 = vmatprep.subr.bf16.mxu0 %v2565_v19  ;;  %s2444_s17 = scalar_lea.vmem %s2069_s3, 32  ;;  %p2449_p6 = scmp.lt.s32.totalorder %s2069_s3, %s2069_s3 }
  0x20   :  { %v358_v46 = vsel %vm357_vm0, %v356_v44, %v354_v43  ;;  %v2687_v61 = vrot.slane %v81_v57, %v85_v54  ;;  %v2689_v33 = vrot.slane %v81_v57, %v89_v58  ;;  %v93_v58 = vsub.s32 2, %v84_v50  ;;  %p2445_p5 = scmp.ne.s32.totalorder %s2069_s3, %s2444_s17  ;;  %p2450_p7 = scmp.lt.s32.totalorder %s2444_s17, %s2444_s17 }
  0x21   :  { %320 = vmatpush1.bf16.msra.mxu1 %v2568_v20  ;;  %v359_v47 = vpack.c.b16 %v358_v46, %v358_v46  ;;  %v97_v46 = vsub.s32 3, %v84_v50 }
  0x22   :  { %321 = vmatprep.subr.bf16.mxu1 %v2571_v21  ;;  %279 = vmatpush1.bf16.msra.mxu0 %v2574_v22  ;;  %p2451_p8 = por %p2450_p7, %p2449_p6 }
  0x23   :  { %280 = vmatprep.subr.bf16.mxu0 %v2577_v23  ;;  %v2693_v54 = vrot.slane %v81_v57, %v97_v46 }
  0x24   :  { %p2452_p9 = pnand %p2451_p8, %p2445_p5 }
  0x25   :  { %322 = vmatpush1.bf16.msra.mxu1 %v2580_v24 }
  0x26   :  { %323 = vmatprep.subr.bf16.mxu1 %v2583_v25  ;;  %281 = vmatpush1.bf16.msra.mxu0 %v2586_v26 }
  0x27   :  { %282 = vmatprep.subr.bf16.mxu0 %v2591_v28 }
  0x29   :  { %324 = vmatpush1.bf16.msra.mxu1 %v2589_v27 }
  0x2a   :  { %325 = vmatprep.subr.bf16.mxu1 %v2596_v30  ;;  %283 = vmatpush1.bf16.msra.mxu0 %v2594_v29 }
  0x2b   :  { %284 = vmatprep.subr.bf16.mxu0 %v2602_v32 }
  0x2d   :  { %326 = vmatpush1.bf16.msra.mxu1 %v2608_v35 }
  0x2e   :  { %398 = vmatprep.subr.bf16.mxu1 %v2618_v40  ;;  %285 = vmatpush1.bf16.msra.mxu0 %v2612_v37 }
  0x2f   :  { %499 = vmatprep.subr.bf16.mxu0 %v2522_v4 }
  0x30   :  { %344 = vmatmul.mubr.bf16.vlgmr.msra.gmra.mxu1 %v109_v41 }
  0x31   :  { %399 = vmatpush1.bf16.msra.mxu1 %v2626_v42  ;;  %416 = vmatprep.mubr.bf16.mxu1 %v2471_v0 }
  0x32   :  { %303 = vmatmul.mubr.bf16.vlgmr.msra.gmra.mxu0 %v109_v41  ;;  %439 = vmatprep.subr.bf16.mxu1 %v2632_v45 }
  0x33   :  { %500 = vmatpush1.bf16.msra.mxu0 %v2524_v5  ;;  %531 = vmatprep.mubr.bf16.mxu0 %v2471_v0 }
  0x34   :  { %501 = vmatprep.subr.bf16.mxu0 %v2532_v8 }
  0x37   :  { %502 = vmatpush1.bf16.msra.mxu0 %v2536_v9 }
  0x38   :  { %2113 = vmatmul.mubr.msk.bf16.vlgmr.msra.gmra.mxu1 %vm380_vm1, %v359_v47  ;;  %503 = vmatprep.subr.bf16.mxu0 %v2544_v12 }
  0x39   :  { %440 = vmatpush1.bf16.msra.mxu1 %v2646_v48  ;;  %457 = vmatprep.mubr.bf16.mxu1 %v2471_v0 }
  0x3a   :  { %540 = vmatprep.subr.bf16.mxu1 %v2517_v2 }
  0x3b   :  { %504 = vmatpush1.bf16.msra.mxu0 %v2550_v14 }
  0x3c   :  { %505 = vmatprep.subr.bf16.mxu0 %v2553_v15 }
  0x3f   :  { %506 = vmatpush1.bf16.msra.mxu0 %v2562_v18 }
  0x40   :  { %2114 = vmatmul.mubr.msk.bf16.vlgmr.msra.gmra.mxu1 %vm380_vm1, %v359_v47  ;;  %507 = vmatprep.subr.bf16.mxu0 %v2565_v19 }
  0x41   :  { %541 = vmatpush1.bf16.msra.mxu1 %v2519_v3  ;;  %572 = vmatprep.mubr.bf16.mxu1 %v2471_v0 }
  0x42   :  { %542 = vmatprep.subr.bf16.mxu1 %v2527_v6 }
  0x43   :  { %508 = vmatpush1.bf16.msra.mxu0 %v2574_v22 }
  0x44   :  { %509 = vmatprep.subr.bf16.mxu0 %v2577_v23 }
  0x45   :  { %543 = vmatpush1.bf16.msra.mxu1 %v2529_v7 }
  0x46   :  { %544 = vmatprep.subr.bf16.mxu1 %v2539_v10 }
  0x47   :  { %510 = vmatpush1.bf16.msra.mxu0 %v2586_v26 }
  0x48   :  { %511 = vmatprep.subr.bf16.mxu0 %v2591_v28 }
  0x49   :  { %545 = vmatpush1.bf16.msra.mxu1 %v2542_v11 }
  0x4a   :  { %546 = vmatprep.subr.bf16.mxu1 %v2547_v13 }
  0x4b   :  { %512 = vmatpush1.bf16.msra.mxu0 %v2594_v29 }
  0x4c   :  { %513 = vmatprep.subr.bf16.mxu0 %v2602_v32 }
  0x4d   :  { %547 = vmatpush1.bf16.msra.mxu1 %v2556_v16 }
  0x4e   :  { %548 = vmatprep.subr.bf16.mxu1 %v2559_v17 }
  0x4f   :  { %514 = vmatpush1.bf16.msra.mxu0 %v2612_v37 }
  0x50   :  { %706 = vmatprep.subr.bf16.mxu0 %v2522_v4 }
  0x51   :  { %549 = vmatpush1.bf16.msra.mxu1 %v2568_v20 }
  0x52   :  { %550 = vmatprep.subr.bf16.mxu1 %v2571_v21 }
  0x55   :  { %551 = vmatpush1.bf16.msra.mxu1 %v2580_v24 }
  0x56   :  { %552 = vmatprep.subr.bf16.mxu1 %v2583_v25 }
  0x59   :  { %553 = vmatpush1.bf16.msra.mxu1 %v2589_v27 }
  0x5a   :  { %554 = vmatprep.subr.bf16.mxu1 %v2596_v30 }
  0x5d   :  { %555 = vmatpush1.bf16.msra.mxu1 %v2608_v35 }
  0x5e   :  { %605 = vmatprep.subr.bf16.mxu1 %v2618_v40 }
  0xf0   :  { %v345_v51 = vpop.f32.mrf.mxu1 }
  0xf2   :  { %v347_v52 = vpop.f32.mrf.mxu1  ;;  %v304_v53 = vpop.f32.mrf.mxu0 }
  0xf4   :  { %v349_v55 = vpop.f32.mrf.mxu1  ;;  %v306_v56 = vpop.f32.mrf.mxu0 }
  0xf6   :  { %v350_v59 = vpop.f32.mrf.mxu1  ;;  %v308_v60 = vpop.f32.mrf.mxu0 }
  0xf8   :  { %v418_v62 = vpop.f32.mrf.mxu1  ;;  %v309_v63 = vpop.f32.mrf.mxu0 }
  0xf9   :  { %v419_v31 = vadd.f32 %v418_v62, %v304_v53 }
  0xfa   :  { %v420_v34 = vpop.f32.mrf.mxu1 }
  0xfb   :  { %v466_v36 = vadd.f32 %v419_v31, %v2687_v61  ;;  %v421_v38 = vadd.f32 %v420_v34, %v306_v56  ;;  %v2696_v56 = vrot.slane %v81_v57, %v93_v58  ;;  %v494_v58 = vld [vmem:[%s3185_s0 + $0x1] sm:$0x1] }
  0xfc   :  { %v422_v39 = vpop.f32.mrf.mxu1 }
  0xfd   :  { %v2115_v41 = vmul.f32 -1.442695, %v466_v36  ;;  %v467_v43 = vadd.f32 %v421_v38, %v2689_v33 }
  0xfe   :  { %v423_v44 = vpop.f32.mrf.mxu1 }
  0xff   :  { %2260 = vpow2.f32 %v2115_v41  ;;  %v2116_v47 = vmul.f32 -1.442695, %v467_v43  ;;  %v104_v43 = vld [vmem:[#allocation3] sm:$0x3] }
 0x100   :  { %v459_v49 = vpop.f32.mrf.mxu1 }
 0x101   :  { %2262 = vpow2.f32 %v2116_v47  ;;  %v460_v63 = vadd.f32 %v459_v49, %v345_v51  ;;  %v495_v49 = vld [vmem:[%s3185_s0 + $0x9] sm:$0x1] }
 0x102   :  { %v461_v55 = vpop.f32.mrf.mxu1 }
 0x103   :  { %v462_v53 = vadd.f32 %v461_v55, %v347_v52  ;;  %v468_v36 = vadd.f32 %v460_v63, %v2696_v56 }
 0x104   :  { %v463_v59 = vpop.f32.mrf.mxu1 }
 0x105   :  { %v469_v60 = vadd.f32 %v462_v53, %v2693_v54  ;;  %v497_v53 = vpack.c.bf16 %v495_v49, %v495_v49  ;;  %v496_v59 = vpack.c.bf16 %v494_v58, %v494_v58 }
 0x106   :  { %v464_v62 = vpop.f32.mrf.mxu1 }
 0x107   :  { %v2117_v31 = vmul.f32 -1.442695, %v469_v60  ;;  %v584_v60 = vunpack.c.l.b16 %v497_v53 }
 0x109   :  { %2264 = vpow2.f32 %v2117_v31 }
 0x10c   :  { %v2261_v34 = vpop.eup %2260 }
 0x10d   :  { %v473_v38 = vadd.f32 1.0, %v2261_v34  ;;  %v583_v34 = vunpack.c.l.b16 %v496_v59 }
 0x10e   :  { %v2263_v39 = vpop.eup %2262 }
 0x10f   :  { %2266 = vrcp.f32 %v473_v38  ;;  %v479_v41 = vadd.f32 1.0, %v2263_v39 }
 0x110   :  { %2268 = vtanh.f32 %v468_v36  ;;  %v585_v36 = vrot.slane %v584_v60, 7 }
 0x111   :  { %2270 = vrcp.f32 %v479_v41 }
 0x112   :  { %v586_v39 = vsel %vm357_vm0, %v585_v36, %v583_v34 }
 0x113   :  { %v587_v41 = vpack.c.b16 %v586_v39, %v586_v39 }
 0x116   :  { %v2265_v52 = vpop.eup %2264 }
 0x117   :  { %v486_v47 = vadd.f32 1.0, %v2265_v52 }
 0x119   :  { %2272 = vrcp.f32 %v486_v47 }
 0x11c   :  { %v2267_v50 = vpop.eup %2266 }
 0x11d   :  { %v2269_v44 = vpop.eup %2268 }
 0x11e   :  { %v2271_v46 = vpop.eup %2270  ;;  %v490_v55 = vmul.f32 %v2269_v44, %v2267_v50 }
 0x11f   :  { %v489_v57 = vmul.f32 %v2271_v46, %v104_v43 }
 0x121   :  { %v2699_v51 = vadd.f32 %v490_v55, %v489_v57 }
 0x123   :  { %2274 = vtanh.f32 %v2699_v51 }
 0x126   :  { %v2273_v62 = vpop.eup %2272 }
 0x130   :  { %v2275_v63 = vpop.eup %2274 }
 0x131   :  { %v493_v31 = vmul.f32 %v2275_v63, %v2273_v62 }
 0x133   :  { %v498_v38 = vpack.c.bf16 %v493_v31, %v493_v31 }
 0x135   :  { %532 = vmatmul.mubr.bf16.vlgmr.msra.gmra.mxu0 %v498_v38  ;;  %573 = vmatmul.mubr.bf16.vlgmr.msra.gmra.mxu1 %v498_v38 }
 0x136   :  { %606 = vmatpush1.bf16.msra.mxu1 %v2626_v42  ;;  %623 = vmatprep.mubr.bf16.mxu1 %v2471_v0 }
 0x137   :  { %646 = vmatprep.subr.bf16.mxu1 %v2632_v45  ;;  %707 = vmatpush1.bf16.msra.mxu0 %v2524_v5 }
 0x138   :  { %708 = vmatprep.subr.bf16.mxu0 %v2532_v8  ;;  %738 = vmatprep.mubr.bf16.mxu0 %v2471_v0 }
 0x13b   :  { %709 = vmatpush1.bf16.msra.mxu0 %v2536_v9 }
 0x13c   :  { %710 = vmatprep.subr.bf16.mxu0 %v2544_v12 }
 0x13d   :  { %2118 = vmatmul.mubr.msk.bf16.vlgmr.msra.gmra.mxu1 %vm380_vm1, %v587_v41 }
 0x13e   :  { %647 = vmatpush1.bf16.msra.mxu1 %v2646_v48  ;;  %664 = vmatprep.mubr.bf16.mxu1 %v2471_v0 }
 0x13f   :  { %747 = vmatprep.subr.bf16.mxu1 %v2517_v2  ;;  %711 = vmatpush1.bf16.msra.mxu0 %v2550_v14 }
 0x140   :  { %712 = vmatprep.subr.bf16.mxu0 %v2553_v15 }
 0x143   :  { %713 = vmatpush1.bf16.msra.mxu0 %v2562_v18 }
 0x144   :  { %714 = vmatprep.subr.bf16.mxu0 %v2565_v19 }
 0x145   :  { %2119 = vmatmul.mubr.msk.bf16.vlgmr.msra.gmra.mxu1 %vm380_vm1, %v587_v41 }
 0x146   :  { %748 = vmatpush1.bf16.msra.mxu1 %v2519_v3  ;;  %779 = vmatprep.mubr.bf16.mxu1 %v2471_v0 }
 0x147   :  { %749 = vmatprep.subr.bf16.mxu1 %v2527_v6  ;;  %715 = vmatpush1.bf16.msra.mxu0 %v2574_v22 }
 0x148   :  { %716 = vmatprep.subr.bf16.mxu0 %v2577_v23 }
 0x14a   :  { %750 = vmatpush1.bf16.msra.mxu1 %v2529_v7 }
 0x14b   :  { %751 = vmatprep.subr.bf16.mxu1 %v2539_v10  ;;  %717 = vmatpush1.bf16.msra.mxu0 %v2586_v26 }
 0x14c   :  { %718 = vmatprep.subr.bf16.mxu0 %v2591_v28 }
 0x14e   :  { %752 = vmatpush1.bf16.msra.mxu1 %v2542_v11 }
 0x14f   :  { %753 = vmatprep.subr.bf16.mxu1 %v2547_v13  ;;  %719 = vmatpush1.bf16.msra.mxu0 %v2594_v29 }
 0x150   :  { %720 = vmatprep.subr.bf16.mxu0 %v2602_v32 }
 0x152   :  { %754 = vmatpush1.bf16.msra.mxu1 %v2556_v16 }
 0x153   :  { %755 = vmatprep.subr.bf16.mxu1 %v2559_v17  ;;  %721 = vmatpush1.bf16.msra.mxu0 %v2612_v37 }
 0x154   :  { %812 = vmatprep.subr.bf16.mxu0 %v2618_v40 }
 0x156   :  { %756 = vmatpush1.bf16.msra.mxu1 %v2568_v20 }
 0x157   :  { %757 = vmatprep.subr.bf16.mxu1 %v2571_v21 }
 0x15a   :  { %758 = vmatpush1.bf16.msra.mxu1 %v2580_v24 }
 0x15b   :  { %759 = vmatprep.subr.bf16.mxu1 %v2583_v25 }
 0x15e   :  { %760 = vmatpush1.bf16.msra.mxu1 %v2589_v27 }
 0x15f   :  { %761 = vmatprep.subr.bf16.mxu1 %v2596_v30 }
 0x162   :  { %762 = vmatpush1.bf16.msra.mxu1 %v2608_v35 }
 0x163   :  { %853 = vmatprep.subr.bf16.mxu1 %v2632_v45 }
 0x1f5   :  { %v533_v52 = vpop.f32.mrf.mxu0  ;;  %v574_v50 = vpop.f32.mrf.mxu1 }
 0x1f7   :  { %v535_v43 = vpop.f32.mrf.mxu0  ;;  %v576_v44 = vpop.f32.mrf.mxu1 }
 0x1f9   :  { %v537_v46 = vpop.f32.mrf.mxu0  ;;  %v578_v47 = vpop.f32.mrf.mxu1 }
 0x1fb   :  { %v538_v57 = vpop.f32.mrf.mxu0  ;;  %v579_v55 = vpop.f32.mrf.mxu1 }
 0x1fd   :  { %v625_v49 = vpop.f32.mrf.mxu1 }
 0x1fe   :  { %v626_v53 = vadd.f32 %v625_v49, %v533_v52 }
 0x1ff   :  { %v627_v58 = vpop.f32.mrf.mxu1 }
 0x200   :  { %v673_v59 = vadd.f32 %v626_v53, %v2687_v61  ;;  %v628_v60 = vadd.f32 %v627_v58, %v535_v43 }
 0x201   :  { %v629_v62 = vpop.f32.mrf.mxu1 }
 0x202   :  { %v2120_v63 = vmul.f32 -1.442695, %v673_v59  ;;  %v674_v31 = vadd.f32 %v628_v60, %v2689_v33 }
 0x203   :  { %v630_v34 = vpop.f32.mrf.mxu1 }
 0x204   :  { %2276 = vpow2.f32 %v2120_v63  ;;  %v2121_v36 = vmul.f32 -1.442695, %v674_v31 }
 0x205   :  { %v666_v38 = vpop.f32.mrf.mxu1 }
 0x206   :  { %2278 = vpow2.f32 %v2121_v36  ;;  %v667_v52 = vadd.f32 %v666_v38, %v574_v50  ;;  %v702_v38 = vld [vmem:[%s3185_s0 + $0xa] sm:$0x1] }
 0x207   :  { %v668_v39 = vpop.f32.mrf.mxu1 }
 0x208   :  { %v669_v41 = vadd.f32 %v668_v39, %v576_v44  ;;  %v675_v43 = vadd.f32 %v667_v52, %v2696_v56  ;;  %v704_v39 = vpack.c.bf16 %v702_v38, %v702_v38 }
 0x209   :  { %v670_v46 = vpop.f32.mrf.mxu1 }
 0x20a   :  { %v676_v47 = vadd.f32 %v669_v41, %v2693_v54  ;;  %v701_v41 = vld [vmem:[%s3185_s0 + $0x2] sm:$0x1] }
 0x20b   :  { %v671_v57 = vpop.f32.mrf.mxu1  ;;  %v703_v46 = vpack.c.bf16 %v701_v41, %v701_v41 }
 0x20c   :  { %v2122_v55 = vmul.f32 -1.442695, %v676_v47  ;;  %v791_v47 = vunpack.c.l.b16 %v704_v39 }
 0x20e   :  { %2280 = vpow2.f32 %v2122_v55  ;;  %v790_v55 = vunpack.c.l.b16 %v703_v46 }
 0x211   :  { %v2277_v49 = vpop.eup %2276 }
 0x212   :  { %v680_v53 = vadd.f32 1.0, %v2277_v49  ;;  %v792_v49 = vrot.slane %v791_v47, 7 }
 0x213   :  { %v2279_v58 = vpop.eup %2278 }
 0x214   :  { %2282 = vrcp.f32 %v680_v53  ;;  %v686_v59 = vadd.f32 1.0, %v2279_v58  ;;  %v793_v53 = vsel %vm357_vm0, %v792_v49, %v790_v55 }
 0x215   :  { %2284 = vtanh.f32 %v675_v43  ;;  %v794_v58 = vpack.c.b16 %v793_v53, %v793_v53 }
 0x216   :  { %2286 = vrcp.f32 %v686_v59 }
 0x21b   :  { %v2281_v60 = vpop.eup %2280 }
 0x21c   :  { %v693_v31 = vadd.f32 1.0, %v2281_v60 }
 0x21e   :  { %2288 = vrcp.f32 %v693_v31 }
 0x221   :  { %v2283_v62 = vpop.eup %2282 }
 0x222   :  { %v2285_v63 = vpop.eup %2284 }
 0x223   :  { %v2287_v44 = vpop.eup %2286  ;;  %v697_v36 = vmul.f32 %v2285_v63, %v2283_v62 }
 0x224   :  { %v696_v34 = vmul.f32 %v2287_v44, %v2699_v51 }
 0x226   :  { %v2756_v50 = vadd.f32 %v697_v36, %v696_v34 }
 0x228   :  { %2290 = vtanh.f32 %v2756_v50 }
 0x22b   :  { %v2289_v57 = vpop.eup %2288 }
 0x235   :  { %v2291_v52 = vpop.eup %2290 }
 0x236   :  { %v700_v51 = vmul.f32 %v2291_v52, %v2289_v57 }
 0x238   :  { %v705_v43 = vpack.c.bf16 %v700_v51, %v700_v51 }
 0x23a   :  { %739 = vmatmul.mubr.bf16.vlgmr.msra.gmra.mxu0 %v705_v43  ;;  %780 = vmatmul.mubr.bf16.vlgmr.msra.gmra.mxu1 %v705_v43 }
 0x23b   :  { %813 = vmatpush1.bf16.msra.mxu0 %v2626_v42  ;;  %854 = vmatpush1.bf16.msra.mxu1 %v2646_v48 }
 0x23c   :  { %830 = vmatprep.mubr.bf16.mxu0 %v2471_v0  ;;  %871 = vmatprep.mubr.bf16.mxu1 %v2471_v0 }
 0x23d   :  { %913 = vmatprep.subr.bf16.mxu0 %v2522_v4  ;;  %954 = vmatprep.subr.bf16.mxu1 %v2517_v2 }
 0x242   :  { %2123 = vmatmul.mubr.msk.bf16.vlgmr.msra.gmra.mxu0 %vm380_vm1, %v794_v58  ;;  %2124 = vmatmul.mubr.msk.bf16.vlgmr.msra.gmra.mxu1 %vm380_vm1, %v794_v58 }
 0x243   :  { %914 = vmatpush1.bf16.msra.mxu0 %v2524_v5  ;;  %955 = vmatpush1.bf16.msra.mxu1 %v2519_v3 }
 0x244   :  { %915 = vmatprep.subr.bf16.mxu0 %v2532_v8  ;;  %956 = vmatprep.subr.bf16.mxu1 %v2527_v6 }
 0x245   :  { %945 = vmatprep.mubr.bf16.mxu0 %v2471_v0  ;;  %986 = vmatprep.mubr.bf16.mxu1 %v2471_v0 }
 0x247   :  { %916 = vmatpush1.bf16.msra.mxu0 %v2536_v9  ;;  %957 = vmatpush1.bf16.msra.mxu1 %v2529_v7 }
 0x248   :  { %917 = vmatprep.subr.bf16.mxu0 %v2544_v12  ;;  %958 = vmatprep.subr.bf16.mxu1 %v2539_v10 }
 0x24b   :  { %918 = vmatpush1.bf16.msra.mxu0 %v2550_v14  ;;  %959 = vmatpush1.bf16.msra.mxu1 %v2542_v11 }
 0x24c   :  { %919 = vmatprep.subr.bf16.mxu0 %v2553_v15  ;;  %960 = vmatprep.subr.bf16.mxu1 %v2547_v13 }
 0x24f   :  { %920 = vmatpush1.bf16.msra.mxu0 %v2562_v18  ;;  %961 = vmatpush1.bf16.msra.mxu1 %v2556_v16 }
 0x250   :  { %921 = vmatprep.subr.bf16.mxu0 %v2565_v19  ;;  %962 = vmatprep.subr.bf16.mxu1 %v2559_v17 }
 0x253   :  { %922 = vmatpush1.bf16.msra.mxu0 %v2574_v22  ;;  %963 = vmatpush1.bf16.msra.mxu1 %v2568_v20 }
 0x254   :  { %923 = vmatprep.subr.bf16.mxu0 %v2577_v23  ;;  %964 = vmatprep.subr.bf16.mxu1 %v2571_v21 }
 0x257   :  { %924 = vmatpush1.bf16.msra.mxu0 %v2586_v26  ;;  %965 = vmatpush1.bf16.msra.mxu1 %v2580_v24 }
 0x258   :  { %925 = vmatprep.subr.bf16.mxu0 %v2591_v28  ;;  %966 = vmatprep.subr.bf16.mxu1 %v2583_v25 }
 0x25b   :  { %926 = vmatpush1.bf16.msra.mxu0 %v2594_v29  ;;  %967 = vmatpush1.bf16.msra.mxu1 %v2589_v27 }
 0x25c   :  { %927 = vmatprep.subr.bf16.mxu0 %v2602_v32  ;;  %968 = vmatprep.subr.bf16.mxu1 %v2596_v30 }
 0x25f   :  { %928 = vmatpush1.bf16.msra.mxu0 %v2612_v37  ;;  %969 = vmatpush1.bf16.msra.mxu1 %v2608_v35 }
 0x260   :  { %1019 = vmatprep.subr.bf16.mxu0 %v2618_v40  ;;  %1060 = vmatprep.subr.bf16.mxu1 %v2632_v45 }
 0x2fa   :  { %v740_v59 = vpop.f32.mrf.mxu0  ;;  %v781_v60 = vpop.f32.mrf.mxu1 }
 0x2fc   :  { %v742_v62 = vpop.f32.mrf.mxu0  ;;  %v783_v63 = vpop.f32.mrf.mxu1 }
 0x2fe   :  { %v744_v44 = vpop.f32.mrf.mxu0  ;;  %v785_v31 = vpop.f32.mrf.mxu1 }
 0x300   :  { %v745_v34 = vpop.f32.mrf.mxu0  ;;  %v786_v36 = vpop.f32.mrf.mxu1 }
 0x302   :  { %v832_v38 = vpop.f32.mrf.mxu0  ;;  %v873_v39 = vpop.f32.mrf.mxu1 }
 0x303   :  { %v833_v41 = vadd.f32 %v832_v38, %v740_v59  ;;  %v874_v36 = vadd.f32 %v873_v39, %v781_v60  ;;  %v909_v39 = vld [vmem:[%s3185_s0 + $0xb] sm:$0x1] }
 0x304   :  { %v834_v46 = vpop.f32.mrf.mxu0  ;;  %v875_v47 = vpop.f32.mrf.mxu1 }
 0x305   :  { %v880_v57 = vadd.f32 %v833_v41, %v2687_v61  ;;  %v835_v52 = vadd.f32 %v834_v46, %v742_v62  ;;  %v876_v31 = vadd.f32 %v875_v47, %v783_v63  ;;  %v882_v1 = vadd.f32 %v874_v36, %v2696_v56 }
 0x306   :  { %v836_v51 = vpop.f32.mrf.mxu0  ;;  %v877_v55 = vpop.f32.mrf.mxu1 }
 0x307   :  { %v2125_v49 = vmul.f32 -1.442695, %v880_v57  ;;  %v881_v43 = vadd.f32 %v835_v52, %v2689_v33  ;;  %v883_v34 = vadd.f32 %v876_v31, %v2693_v54 }
 0x308   :  { %v837_v53 = vpop.f32.mrf.mxu0  ;;  %v878_v58 = vpop.f32.mrf.mxu1 }
 0x309   :  { %2292 = vpow2.f32 %v2125_v49  ;;  %v2126_v44 = vmul.f32 -1.442695, %v881_v43  ;;  %v2127_v59 = vmul.f32 -1.442695, %v883_v34  ;;  %v911_v43 = vpack.c.bf16 %v909_v39, %v909_v39  ;;  %v1116_v39 = vld [vmem:[%s3185_s0 + $0xc] sm:$0x1] }
 0x30b   :  { %2294 = vpow2.f32 %v2126_v44  ;;  %v998_v58 = vunpack.c.l.b16 %v911_v43  ;;  %v1118_v43 = vpack.c.bf16 %v1116_v39, %v1116_v39 }
 0x30c   :  { %2296 = vpow2.f32 %v2127_v59 }
 0x30d   :  { %v999_v36 = vrot.slane %v998_v58, 7  ;;  %v1205_v58 = vunpack.c.l.b16 %v1118_v43 }
 0x316   :  { %v2293_v38 = vpop.eup %2292 }
 0x317   :  { %v887_v41 = vadd.f32 1.0, %v2293_v38 }
 0x318   :  { %v2295_v62 = vpop.eup %2294 }
 0x319   :  { %2298 = vrcp.f32 %v887_v41  ;;  %v893_v46 = vadd.f32 1.0, %v2295_v62  ;;  %v2297_v57 = vpop.eup %2296 }
 0x31a   :  { %2300 = vtanh.f32 %v882_v1  ;;  %v900_v49 = vadd.f32 1.0, %v2297_v57  ;;  %v908_v1 = vld [vmem:[%s3185_s0 + $0x3] sm:$0x1] }
 0x31b   :  { %2302 = vrcp.f32 %v893_v46  ;;  %v910_v53 = vpack.c.bf16 %v908_v1, %v908_v1  ;;  %v1115_v1 = vld [vmem:[%s3185_s0 + $0x4] sm:$0x1] }
 0x31c   :  { %2304 = vrcp.f32 %v900_v49 }
 0x326   :  { %v2299_v52 = vpop.eup %2298 }
 0x327   :  { %v2301_v51 = vpop.eup %2300 }
 0x328   :  { %v2303_v55 = vpop.eup %2302  ;;  %v904_v63 = vmul.f32 %v2301_v51, %v2299_v52 }
 0x329   :  { %v903_v47 = vmul.f32 %v2303_v55, %v2756_v50  ;;  %v2305_v44 = vpop.eup %2304  ;;  %v997_v50 = vunpack.c.l.b16 %v910_v53  ;;  %v1117_v53 = vpack.c.bf16 %v1115_v1, %v1115_v1 }
 0x32b   :  { %v2813_v60 = vadd.f32 %v904_v63, %v903_v47  ;;  %v1000_v38 = vsel %vm357_vm0, %v999_v36, %v997_v50  ;;  %v1206_v50 = vrot.slane %v1205_v58, 7 }
 0x32c   :  { %v1001_v41 = vpack.c.b16 %v1000_v38, %v1000_v38  ;;  %v2884_v38 = vld [vmem:[#allocation4 + $0xe4] ss:$16 sps:$4 sm:$0xff]  }
 0x32d   :  { %2306 = vtanh.f32 %v2813_v60 }
 0x33a   :  { %v2307_v31 = vpop.eup %2306 }
 0x33b   :  { %v907_v34 = vmul.f32 %v2307_v31, %v2305_v44 }
 0x33d   :  { %v912_v59 = vpack.c.bf16 %v907_v34, %v907_v34 }
 0x33f   :  { %946 = vmatmul.mubr.bf16.vlgmr.msra.gmra.mxu0 %v912_v59  ;;  %987 = vmatmul.mubr.bf16.vlgmr.msra.gmra.mxu1 %v912_v59 }
 0x340   :  { %1020 = vmatpush1.bf16.msra.mxu0 %v2626_v42  ;;  %1061 = vmatpush1.bf16.msra.mxu1 %v2646_v48 }
 0x341   :  { %1037 = vmatprep.mubr.bf16.mxu0 %v2471_v0  ;;  %1078 = vmatprep.mubr.bf16.mxu1 %v2471_v0 }
 0x342   :  { %1120 = vmatprep.subr.bf16.mxu0 %v2522_v4  ;;  %1161 = vmatprep.subr.bf16.mxu1 %v2517_v2 }
 0x347   :  { %2128 = vmatmul.mubr.msk.bf16.vlgmr.msra.gmra.mxu0 %vm380_vm1, %v1001_v41  ;;  %2129 = vmatmul.mubr.msk.bf16.vlgmr.msra.gmra.mxu1 %vm380_vm1, %v1001_v41  ;;  %v2887_v41 = vld [vmem:[#allocation4 + $0xec] ss:$16 sps:$4 sm:$0xff]  }
 0x348   :  { %1121 = vmatpush1.bf16.msra.mxu0 %v2524_v5  ;;  %1162 = vmatpush1.bf16.msra.mxu1 %v2519_v3 }
 0x349   :  { %1122 = vmatprep.subr.bf16.mxu0 %v2532_v8  ;;  %1163 = vmatprep.subr.bf16.mxu1 %v2527_v6 }
 0x34a   :  { %1152 = vmatprep.mubr.bf16.mxu0 %v2471_v0  ;;  %1193 = vmatprep.mubr.bf16.mxu1 %v2471_v0 }
 0x34c   :  { %1123 = vmatpush1.bf16.msra.mxu0 %v2536_v9  ;;  %1164 = vmatpush1.bf16.msra.mxu1 %v2529_v7 }
 0x34d   :  { %1124 = vmatprep.subr.bf16.mxu0 %v2544_v12  ;;  %1165 = vmatprep.subr.bf16.mxu1 %v2539_v10 }
 0x350   :  { %1125 = vmatpush1.bf16.msra.mxu0 %v2550_v14  ;;  %1166 = vmatpush1.bf16.msra.mxu1 %v2542_v11 }
 0x351   :  { %1126 = vmatprep.subr.bf16.mxu0 %v2553_v15  ;;  %1167 = vmatprep.subr.bf16.mxu1 %v2547_v13 }
 0x354   :  { %1127 = vmatpush1.bf16.msra.mxu0 %v2562_v18  ;;  %1168 = vmatpush1.bf16.msra.mxu1 %v2556_v16 }
 0x355   :  { %1128 = vmatprep.subr.bf16.mxu0 %v2565_v19  ;;  %1169 = vmatprep.subr.bf16.mxu1 %v2559_v17 }
 0x358   :  { %1129 = vmatpush1.bf16.msra.mxu0 %v2574_v22  ;;  %1170 = vmatpush1.bf16.msra.mxu1 %v2568_v20 }
 0x359   :  { %1130 = vmatprep.subr.bf16.mxu0 %v2577_v23  ;;  %1171 = vmatprep.subr.bf16.mxu1 %v2571_v21 }
 0x35c   :  { %1131 = vmatpush1.bf16.msra.mxu0 %v2586_v26  ;;  %1172 = vmatpush1.bf16.msra.mxu1 %v2580_v24 }
 0x35d   :  { %1132 = vmatprep.subr.bf16.mxu0 %v2591_v28  ;;  %1173 = vmatprep.subr.bf16.mxu1 %v2583_v25 }
 0x360   :  { %1133 = vmatpush1.bf16.msra.mxu0 %v2594_v29  ;;  %1174 = vmatpush1.bf16.msra.mxu1 %v2589_v27 }
 0x361   :  { %1134 = vmatprep.subr.bf16.mxu0 %v2602_v32  ;;  %1175 = vmatprep.subr.bf16.mxu1 %v2596_v30 }
 0x364   :  { %1135 = vmatpush1.bf16.msra.mxu0 %v2612_v37  ;;  %1176 = vmatpush1.bf16.msra.mxu1 %v2608_v35 }
 0x365   :  { %1226 = vmatprep.subr.bf16.mxu0 %v2618_v40  ;;  %1267 = vmatprep.subr.bf16.mxu1 %v2632_v45 }
 0x3ff   :  { %v947_v2 = vpop.f32.mrf.mxu0  ;;  %v988_v3 = vpop.f32.mrf.mxu1 }
 0x401   :  { %v949_v4 = vpop.f32.mrf.mxu0  ;;  %v990_v5 = vpop.f32.mrf.mxu1 }
 0x403   :  { %v951_v6 = vpop.f32.mrf.mxu0  ;;  %v992_v7 = vpop.f32.mrf.mxu1 }
 0x404   :  { %v2909_v6 = vld [vmem:[#allocation4 + $0xc8] ss:$16 sps:$4 sm:$0xff]   ;;  %v2912_v7 = vld [vmem:[#allocation4 + $0xa4] ss:$16 sps:$4 sm:$0xff]  }
 0x405   :  { %v952_v8 = vpop.f32.mrf.mxu0  ;;  %v993_v9 = vpop.f32.mrf.mxu1 }
 0x406   :  { %v2915_v8 = vld [vmem:[#allocation4 + $0xac] ss:$16 sps:$4 sm:$0xff]   ;;  %v2918_v9 = vld [vmem:[#allocation4 + $0xa0] ss:$16 sps:$4 sm:$0xff]  }
 0x407   :  { %v1039_v10 = vpop.f32.mrf.mxu0  ;;  %v1080_v11 = vpop.f32.mrf.mxu1 }
 0x408   :  { %v1040_v12 = vadd.f32 %v1039_v10, %v947_v2  ;;  %v1081_v26 = vadd.f32 %v1080_v11, %v988_v3  ;;  %v2898_v3 = vld [vmem:[#allocation4 + $0xc4] ss:$16 sps:$4 sm:$0xff]   ;;  %v2921_v10 = vld [vmem:[#allocation4 + $0xa8] ss:$16 sps:$4 sm:$0xff]  }
 0x409   :  { %v1041_v13 = vpop.f32.mrf.mxu0  ;;  %v1082_v14 = vpop.f32.mrf.mxu1  ;;  %v2924_v11 = vld [vmem:[#allocation4 + $0x84] ss:$16 sps:$4 sm:$0xff]  }
 0x40a   :  { %v1087_v15 = vadd.f32 %v1040_v12, %v2687_v61  ;;  %v1042_v16 = vadd.f32 %v1041_v13, %v949_v4  ;;  %v1083_v24 = vadd.f32 %v1082_v14, %v990_v5  ;;  %v1089_v29 = vadd.f32 %v1081_v26, %v2696_v56  ;;  %v2901_v4 = vld [vmem:[#allocation4 + $0xcc] ss:$16 sps:$4 sm:$0xff]   ;;  %v2906_v5 = vld [vmem:[#allocation4 + $0xc0] ss:$16 sps:$4 sm:$0xff]   ;;  %v2933_v14 = vld [vmem:[#allocation4 + $0x88] ss:$16 sps:$4 sm:$0xff]  }
 0x40b   :  { %v1043_v17 = vpop.f32.mrf.mxu0  ;;  %v1084_v18 = vpop.f32.mrf.mxu1  ;;  %v2927_v12 = vld [vmem:[#allocation4 + $0x8c] ss:$16 sps:$4 sm:$0xff]   ;;  %v2930_v13 = vld [vmem:[#allocation4 + $0x80] ss:$16 sps:$4 sm:$0xff]   ;;  %v2969_v26 = vld [vmem:[#allocation4 + $0x28] ss:$16 sps:$4 sm:$0xff]  }
 0x40c   :  { %v2130_v19 = vmul.f32 -1.442695, %v1087_v15  ;;  %v1088_v20 = vadd.f32 %v1042_v16, %v2689_v33  ;;  %v1090_v25 = vadd.f32 %v1083_v24, %v2693_v54  ;;  %v2936_v15 = vld [vmem:[#allocation4 + $0x64] ss:$16 sps:$4 sm:$0xff]   ;;  %v2939_v16 = vld [vmem:[#allocation4 + $0x6c] ss:$16 sps:$4 sm:$0xff]  }
 0x40d   :  { %v1044_v21 = vpop.f32.mrf.mxu0  ;;  %v1085_v22 = vpop.f32.mrf.mxu1  ;;  %v2942_v17 = vld [vmem:[#allocation4 + $0x60] ss:$16 sps:$4 sm:$0xff]   ;;  %v2945_v18 = vld [vmem:[#allocation4 + $0x68] ss:$16 sps:$4 sm:$0xff]   ;;  %v2963_v24 = vld [vmem:[#allocation4 + $0x2c] ss:$16 sps:$4 sm:$0xff]  }
 0x40e   :  { %2308 = vpow2.f32 %v2130_v19  ;;  %v2131_v23 = vmul.f32 -1.442695, %v1088_v20  ;;  %v2132_v27 = vmul.f32 -1.442695, %v1090_v25  ;;  %v2948_v19 = vld [vmem:[#allocation4 + $0x44] ss:$16 sps:$4 sm:$0xff]  }
 0x40f   :  { %v2951_v20 = vld [vmem:[#allocation4 + $0x4c] ss:$16 sps:$4 sm:$0xff]   ;;  %v2954_v21 = vld [vmem:[#allocation4 + $0x40] ss:$16 sps:$4 sm:$0xff]   ;;  %v2957_v22 = vld [vmem:[#allocation4 + $0x48] ss:$16 sps:$4 sm:$0xff]  }
 0x410   :  { %2310 = vpow2.f32 %v2131_v23  ;;  %v2960_v23 = vld [vmem:[#allocation4 + $0x24] ss:$16 sps:$4 sm:$0xff]   ;;  %v2966_v25 = vld [vmem:[#allocation4 + $0x20] ss:$16 sps:$4 sm:$0xff]  }
 0x411   :  { %2312 = vpow2.f32 %v2132_v27  ;;  %v2972_v27 = vld [vmem:[#allocation4 + $0x4] ss:$16 sps:$4 sm:$0xff]  }
 0x41b   :  { %v2309_v28 = vpop.eup %2308 }
 0x41c   :  { %v1094_v30 = vadd.f32 1.0, %v2309_v28  ;;  %v2975_v28 = vld [vmem:[#allocation4 + $0xc] ss:$16 sps:$4 sm:$0xff]  }
 0x41d   :  { %v2311_v32 = vpop.eup %2310 }
 0x41e   :  { %2314 = vrcp.f32 %v1094_v30  ;;  %v1100_v62 = vadd.f32 1.0, %v2311_v32  ;;  %v2313_v46 = vpop.eup %2312 }
 0x41f   :  { %2316 = vtanh.f32 %v1089_v29  ;;  %v1107_v55 = vadd.f32 1.0, %v2313_v46 }
 0x420   :  { %2318 = vrcp.f32 %v1100_v62 }
 0x421   :  { %2320 = vrcp.f32 %v1107_v55 }
 0x42b   :  { %v2315_v57 = vpop.eup %2314 }
 0x42c   :  { %v2317_v52 = vpop.eup %2316 }
 0x42d   :  { %v2319_v51 = vpop.eup %2318  ;;  %v1111_v49 = vmul.f32 %v2317_v52, %v2315_v57 }
 0x42e   :  { %v1110_v63 = vmul.f32 %v2319_v51, %v2813_v60  ;;  %v2321_v44 = vpop.eup %2320  ;;  %v1204_v60 = vunpack.c.l.b16 %v1117_v53 }
 0x430   :  { %v2870_v47 = vadd.f32 %v1111_v49, %v1110_v63  ;;  %v1207_v59 = vsel %vm357_vm0, %v1206_v50, %v1204_v60 }
 0x431   :  { %v1208_v2 = vpack.c.b16 %v1207_v59, %v1207_v59 }
 0x432   :  { %2322 = vtanh.f32 %v2870_v47 }
 0x43f   :  { %v2323_v31 = vpop.eup %2322 }
 0x440   :  { %v1114_v34 = vmul.f32 %v2323_v31, %v2321_v44 }
 0x442   :  { %v1119_v36 = vpack.c.bf16 %v1114_v34, %v1114_v34 }
 0x444   :  { %1153 = vmatmul.mubr.bf16.vlgmr.msra.gmra.mxu0 %v1119_v36  ;;  %1194 = vmatmul.mubr.bf16.vlgmr.msra.gmra.mxu1 %v1119_v36 }
 0x445   :  { %1227 = vmatpush1.bf16.msra.mxu0 %v2626_v42  ;;  %1268 = vmatpush1.bf16.msra.mxu1 %v2646_v48  ;;  %v2892_v42 = vld [vmem:[#allocation4 + $0xe0] ss:$16 sps:$4 sm:$0xff]   ;;  %v2895_v48 = vld [vmem:[#allocation4 + $0xe8] ss:$16 sps:$4 sm:$0xff]  }
 0x446   :  { %1244 = vmatprep.mubr.bf16.mxu0 %v2471_v0  ;;  %1285 = vmatprep.mubr.bf16.mxu1 %v2471_v0 }
 0x447   :  { %1327 = vmatprep.subr.bf16.mxu0 %v2884_v38  ;;  %1368 = vmatprep.subr.bf16.mxu1 %v2887_v41 }
 0x44c   :  { %2133 = vmatmul.mubr.msk.bf16.vlgmr.msra.gmra.mxu0 %vm380_vm1, %v1208_v2  ;;  %2134 = vmatmul.mubr.msk.bf16.vlgmr.msra.gmra.mxu1 %vm380_vm1, %v1208_v2 }
 0x44d   :  { %1328 = vmatpush1.bf16.msra.mxu0 %v2892_v42  ;;  %1369 = vmatpush1.bf16.msra.mxu1 %v2895_v48 }
 0x44e   :  { %1329 = vmatprep.subr.bf16.mxu0 %v2898_v3  ;;  %1370 = vmatprep.subr.bf16.mxu1 %v2901_v4 }
 0x44f   :  { %1359 = vmatprep.mubr.bf16.mxu0 %v2471_v0  ;;  %1400 = vmatprep.mubr.bf16.mxu1 %v2471_v0 }
 0x451   :  { %1330 = vmatpush1.bf16.msra.mxu0 %v2906_v5  ;;  %1371 = vmatpush1.bf16.msra.mxu1 %v2909_v6 }
 0x452   :  { %1331 = vmatprep.subr.bf16.mxu0 %v2912_v7  ;;  %1372 = vmatprep.subr.bf16.mxu1 %v2915_v8 }
 0x455   :  { %1332 = vmatpush1.bf16.msra.mxu0 %v2918_v9  ;;  %1373 = vmatpush1.bf16.msra.mxu1 %v2921_v10 }
 0x456   :  { %1333 = vmatprep.subr.bf16.mxu0 %v2924_v11  ;;  %1374 = vmatprep.subr.bf16.mxu1 %v2927_v12 }
 0x459   :  { %1334 = vmatpush1.bf16.msra.mxu0 %v2930_v13  ;;  %1375 = vmatpush1.bf16.msra.mxu1 %v2933_v14 }
 0x45a   :  { %1335 = vmatprep.subr.bf16.mxu0 %v2936_v15  ;;  %1376 = vmatprep.subr.bf16.mxu1 %v2939_v16 }
 0x45d   :  { %1336 = vmatpush1.bf16.msra.mxu0 %v2942_v17  ;;  %1377 = vmatpush1.bf16.msra.mxu1 %v2945_v18 }
 0x45e   :  { %1337 = vmatprep.subr.bf16.mxu0 %v2948_v19  ;;  %1378 = vmatprep.subr.bf16.mxu1 %v2951_v20 }
 0x461   :  { %1338 = vmatpush1.bf16.msra.mxu0 %v2954_v21  ;;  %1379 = vmatpush1.bf16.msra.mxu1 %v2957_v22 }
 0x462   :  { %1339 = vmatprep.subr.bf16.mxu0 %v2960_v23  ;;  %1380 = vmatprep.subr.bf16.mxu1 %v2963_v24 }
 0x465   :  { %1340 = vmatpush1.bf16.msra.mxu0 %v2966_v25  ;;  %1381 = vmatpush1.bf16.msra.mxu1 %v2969_v26 }
 0x466   :  { %1341 = vmatprep.subr.bf16.mxu0 %v2972_v27  ;;  %1382 = vmatprep.subr.bf16.mxu1 %v2975_v28 }
 0x469   :  { %1342 = vmatpush1.bf16.msra.mxu0 %v2612_v37  ;;  %1383 = vmatpush1.bf16.msra.mxu1 %v2608_v35 }
 0x46a   :  { %1433 = vmatprep.subr.bf16.mxu0 %v2618_v40  ;;  %1474 = vmatprep.subr.bf16.mxu1 %v2632_v45 }
 0x504   :  { %v1154_v29 = vpop.f32.mrf.mxu0  ;;  %v1195_v30 = vpop.f32.mrf.mxu1 }
 0x506   :  { %v1156_v32 = vpop.f32.mrf.mxu0  ;;  %v1197_v62 = vpop.f32.mrf.mxu1 }
 0x508   :  { %v1158_v46 = vpop.f32.mrf.mxu0  ;;  %v1199_v57 = vpop.f32.mrf.mxu1 }
 0x50a   :  { %v1159_v52 = vpop.f32.mrf.mxu0  ;;  %v1200_v51 = vpop.f32.mrf.mxu1 }
 0x50c   :  { %v1246_v55 = vpop.f32.mrf.mxu0  ;;  %v1287_v49 = vpop.f32.mrf.mxu1 }
 0x50d   :  { %v1247_v63 = vadd.f32 %v1246_v55, %v1154_v29  ;;  %v1288_v50 = vadd.f32 %v1287_v49, %v1195_v30  ;;  %v1323_v49 = vld [vmem:[%s3185_s0 + $0xd] sm:$0x1] }
 0x50e   :  { %v1248_v39 = vpop.f32.mrf.mxu0  ;;  %v1289_v43 = vpop.f32.mrf.mxu1 }
 0x50f   :  { %v1294_v37 = vadd.f32 %v1247_v63, %v2687_v61  ;;  %v1249_v35 = vadd.f32 %v1248_v39, %v1156_v32  ;;  %v1290_v34 = vadd.f32 %v1289_v43, %v1197_v62  ;;  %v1296_v2 = vadd.f32 %v1288_v50, %v2696_v56 }
 0x510   :  { %v1250_v1 = vpop.f32.mrf.mxu0  ;;  %v1291_v40 = vpop.f32.mrf.mxu1  ;;  %v1325_v43 = vpack.c.bf16 %v1323_v49, %v1323_v49 }
 0x511   :  { %v2135_v53 = vmul.f32 -1.442695, %v1294_v37  ;;  %v1295_v45 = vadd.f32 %v1249_v35, %v2689_v33  ;;  %v1297_v60 = vadd.f32 %v1290_v34, %v2693_v54  ;;  %v1322_v37 = vld [vmem:[%s3185_s0 + $0x5] sm:$0x1]  ;;  %v3005_v34 = vld [vmem:[%s3186_s1 + $0x8] ss:$16 sps:$4 sm:$0xff]  }
 0x512   :  { %v1251_v58 = vpop.f32.mrf.mxu0  ;;  %v1292_v44 = vpop.f32.mrf.mxu1  ;;  %v1324_v35 = vpack.c.bf16 %v1322_v37, %v1322_v37  ;;  %v1412_v1 = vunpack.c.l.b16 %v1325_v43 }
 0x513   :  { %2324 = vpow2.f32 %v2135_v53  ;;  %v2136_v31 = vmul.f32 -1.442695, %v1295_v45  ;;  %v2137_v36 = vmul.f32 -1.442695, %v1297_v60 }
 0x514   :  { %v1413_v58 = vrot.slane %v1412_v1, 7 }
 0x515   :  { %2326 = vpow2.f32 %v2136_v31  ;;  %v2999_v31 = vld [vmem:[%s3186_s1] ss:$16 sps:$4 sm:$0xff]  }
 0x516   :  { %2328 = vpow2.f32 %v2137_v36  ;;  %v3045_v36 = vld [vmem:[#allocation4] ss:$16 sps:$4 sm:$0xff]  }
 0x520   :  { %v2325_v59 = vpop.eup %2324 }
 0x521   :  { %v1301_v29 = vadd.f32 1.0, %v2325_v59  ;;  %v3048_v59 = vld [vmem:[#allocation4 + $0x8] ss:$16 sps:$4 sm:$0xff]  }
 0x522   :  { %v2327_v32 = vpop.eup %2326 }
 0x523   :  { %2330 = vrcp.f32 %v1301_v29  ;;  %v1307_v46 = vadd.f32 1.0, %v2327_v32  ;;  %v2329_v57 = vpop.eup %2328  ;;  %v3060_v29 = vld [vmem:[%s3186_s1 + $0xc] ss:$16 sps:$4 sm:$0xff]  }
 0x524   :  { %2332 = vtanh.f32 %v1296_v2  ;;  %v1314_v63 = vadd.f32 1.0, %v2329_v57  ;;  %v3054_v2 = vld [vmem:[%s3186_s1 + $0x4] ss:$16 sps:$4 sm:$0xff]  }
 0x525   :  { %2334 = vrcp.f32 %v1307_v46 }
 0x526   :  { %2336 = vrcp.f32 %v1314_v63 }
 0x530   :  { %v2331_v52 = vpop.eup %2330 }
 0x531   :  { %v2333_v51 = vpop.eup %2332 }
 0x532   :  { %v2335_v55 = vpop.eup %2334  ;;  %v1318_v62 = vmul.f32 %v2333_v51, %v2331_v52 }
 0x533   :  { %v1317_v39 = vmul.f32 %v2335_v55, %v2870_v47  ;;  %v2337_v40 = vpop.eup %2336  ;;  %v1411_v47 = vunpack.c.l.b16 %v1324_v35 }
 0x535   :  { %v2987_v30 = vadd.f32 %v1318_v62, %v1317_v39  ;;  %v1414_v60 = vsel %vm357_vm0, %v1413_v58, %v1411_v47 }
 0x536   :  { %v1415_v50 = vpack.c.b16 %v1414_v60, %v1414_v60 }
 0x537   :  { %2338 = vtanh.f32 %v2987_v30 }
 0x544   :  { %v2339_v53 = vpop.eup %2338 }
 0x545   :  { %v1321_v45 = vmul.f32 %v2339_v53, %v2337_v40 }
 0x547   :  { %v1326_v44 = vpack.c.bf16 %v1321_v45, %v1321_v45 }
 0x549   :  { %1360 = vmatmul.mubr.bf16.vlgmr.msra.gmra.mxu0 %v1326_v44  ;;  %1401 = vmatmul.mubr.bf16.vlgmr.msra.gmra.mxu1 %v1326_v44 }
 0x54a   :  { %1434 = vmatpush1.bf16.msra.mxu0 %v2999_v31  ;;  %1475 = vmatpush1.bf16.msra.mxu1 %v3005_v34 }
 0x54b   :  { %1451 = vmatprep.mubr.bf16.mxu0 %v2471_v0  ;;  %1492 = vmatprep.mubr.bf16.mxu1 %v2471_v0 }
 0x54c   :  { %1534 = vmatprep.subr.bf16.mxu0 %v2884_v38  ;;  %1575 = vmatprep.subr.bf16.mxu1 %v2887_v41 }
 0x551   :  { %2138 = vmatmul.mubr.msk.bf16.vlgmr.msra.gmra.mxu0 %vm380_vm1, %v1415_v50  ;;  %2139 = vmatmul.mubr.msk.bf16.vlgmr.msra.gmra.mxu1 %vm380_vm1, %v1415_v50 }
 0x552   :  { %1535 = vmatpush1.bf16.msra.mxu0 %v2892_v42  ;;  %1576 = vmatpush1.bf16.msra.mxu1 %v2895_v48 }
 0x553   :  { %1536 = vmatprep.subr.bf16.mxu0 %v2898_v3  ;;  %1577 = vmatprep.subr.bf16.mxu1 %v2901_v4 }
 0x554   :  { %1566 = vmatprep.mubr.bf16.mxu0 %v2471_v0  ;;  %1607 = vmatprep.mubr.bf16.mxu1 %v2471_v0 }
 0x556   :  { %1537 = vmatpush1.bf16.msra.mxu0 %v2906_v5  ;;  %1578 = vmatpush1.bf16.msra.mxu1 %v2909_v6 }
 0x557   :  { %1538 = vmatprep.subr.bf16.mxu0 %v2912_v7  ;;  %1579 = vmatprep.subr.bf16.mxu1 %v2915_v8 }
 0x55a   :  { %1539 = vmatpush1.bf16.msra.mxu0 %v2918_v9  ;;  %1580 = vmatpush1.bf16.msra.mxu1 %v2921_v10 }
 0x55b   :  { %1540 = vmatprep.subr.bf16.mxu0 %v2924_v11  ;;  %1581 = vmatprep.subr.bf16.mxu1 %v2927_v12 }
 0x55e   :  { %1541 = vmatpush1.bf16.msra.mxu0 %v2930_v13  ;;  %1582 = vmatpush1.bf16.msra.mxu1 %v2933_v14 }
 0x55f   :  { %1542 = vmatprep.subr.bf16.mxu0 %v2936_v15  ;;  %1583 = vmatprep.subr.bf16.mxu1 %v2939_v16 }
 0x562   :  { %1543 = vmatpush1.bf16.msra.mxu0 %v2942_v17  ;;  %1584 = vmatpush1.bf16.msra.mxu1 %v2945_v18 }
 0x563   :  { %1544 = vmatprep.subr.bf16.mxu0 %v2948_v19  ;;  %1585 = vmatprep.subr.bf16.mxu1 %v2951_v20 }
 0x566   :  { %1545 = vmatpush1.bf16.msra.mxu0 %v2954_v21  ;;  %1586 = vmatpush1.bf16.msra.mxu1 %v2957_v22 }
 0x567   :  { %1546 = vmatprep.subr.bf16.mxu0 %v2960_v23  ;;  %1587 = vmatprep.subr.bf16.mxu1 %v2963_v24 }
 0x56a   :  { %1547 = vmatpush1.bf16.msra.mxu0 %v2966_v25  ;;  %1588 = vmatpush1.bf16.msra.mxu1 %v2969_v26 }
 0x56b   :  { %1548 = vmatprep.subr.bf16.mxu0 %v2972_v27  ;;  %1589 = vmatprep.subr.bf16.mxu1 %v2975_v28 }
 0x56e   :  { %1549 = vmatpush1.bf16.msra.mxu0 %v3045_v36  ;;  %1590 = vmatpush1.bf16.msra.mxu1 %v3048_v59 }
 0x56f   :  { %1640 = vmatprep.subr.bf16.mxu0 %v3054_v2  ;;  %1681 = vmatprep.subr.bf16.mxu1 %v3060_v29 }
 0x609   :  { %v1361_v32 = vpop.f32.mrf.mxu0  ;;  %v1402_v46 = vpop.f32.mrf.mxu1 }
 0x60b   :  { %v1363_v57 = vpop.f32.mrf.mxu0  ;;  %v1404_v52 = vpop.f32.mrf.mxu1 }
 0x60d   :  { %v1365_v51 = vpop.f32.mrf.mxu0  ;;  %v1406_v55 = vpop.f32.mrf.mxu1 }
 0x60f   :  { %v1366_v63 = vpop.f32.mrf.mxu0  ;;  %v1407_v62 = vpop.f32.mrf.mxu1 }
 0x611   :  { %v1453_v39 = vpop.f32.mrf.mxu0  ;;  %v1494_v49 = vpop.f32.mrf.mxu1 }
 0x612   :  { %v1454_v43 = vadd.f32 %v1453_v39, %v1361_v32  ;;  %v1495_v63 = vadd.f32 %v1494_v49, %v1402_v46  ;;  %v1530_v49 = vld [vmem:[%s3185_s0 + $0xe] sm:$0x1] }
 0x613   :  { %v1455_v37 = vpop.f32.mrf.mxu0  ;;  %v1496_v35 = vpop.f32.mrf.mxu1 }
 0x614   :  { %v1501_v1 = vadd.f32 %v1454_v43, %v2687_v61  ;;  %v1456_v40 = vadd.f32 %v1455_v37, %v1363_v57  ;;  %v1497_v51 = vadd.f32 %v1496_v35, %v1404_v52  ;;  %v1503_v39 = vadd.f32 %v1495_v63, %v2696_v56 }
 0x615   :  { %v1457_v53 = vpop.f32.mrf.mxu0  ;;  %v1498_v45 = vpop.f32.mrf.mxu1 }
 0x616   :  { %v2140_v47 = vmul.f32 -1.442695, %v1501_v1  ;;  %v1502_v58 = vadd.f32 %v1456_v40, %v2689_v33  ;;  %v1504_v55 = vadd.f32 %v1497_v51, %v2693_v54 }
 0x617   :  { %v1458_v44 = vpop.f32.mrf.mxu0  ;;  %v1499_v60 = vpop.f32.mrf.mxu1 }
 0x618   :  { %2340 = vpow2.f32 %v2140_v47  ;;  %v2141_v50 = vmul.f32 -1.442695, %v1502_v58  ;;  %v2142_v32 = vmul.f32 -1.442695, %v1504_v55  ;;  %v1532_v58 = vpack.c.bf16 %v1530_v49, %v1530_v49  ;;  %v1529_v44 = vld [vmem:[%s3185_s0 + $0x6] sm:$0x1] }
 0x619   :  { %v1531_v60 = vpack.c.bf16 %v1529_v44, %v1529_v44 }
 0x61a   :  { %2342 = vpow2.f32 %v2141_v50  ;;  %v1619_v50 = vunpack.c.l.b16 %v1532_v58 }
 0x61b   :  { %2344 = vpow2.f32 %v2142_v32 }
 0x61c   :  { %v1620_v32 = vrot.slane %v1619_v50, 7 }
 0x625   :  { %v2341_v62 = vpop.eup %2340 }
 0x626   :  { %v1508_v43 = vadd.f32 1.0, %v2341_v62 }
 0x627   :  { %v2343_v57 = vpop.eup %2342 }
 0x628   :  { %2346 = vrcp.f32 %v1508_v43  ;;  %v1514_v37 = vadd.f32 1.0, %v2343_v57  ;;  %v2345_v1 = vpop.eup %2344 }
 0x629   :  { %2348 = vtanh.f32 %v1503_v39  ;;  %v1521_v47 = vadd.f32 1.0, %v2345_v1 }
 0x62a   :  { %2350 = vrcp.f32 %v1514_v37 }
 0x62b   :  { %2352 = vrcp.f32 %v1521_v47 }
 0x635   :  { %v2347_v40 = vpop.eup %2346 }
 0x636   :  { %v2349_v53 = vpop.eup %2348 }
 0x637   :  { %v2351_v45 = vpop.eup %2350  ;;  %v1525_v52 = vmul.f32 %v2349_v53, %v2347_v40 }
 0x638   :  { %v1524_v35 = vmul.f32 %v2351_v45, %v2987_v30  ;;  %v2353_v51 = vpop.eup %2352  ;;  %v1618_v30 = vunpack.c.l.b16 %v1531_v60  ;;  %v1737_v45 = vld [vmem:[%s3185_s0 + $0xf] sm:$0x1] }
 0x639   :  { %v1739_v47 = vpack.c.bf16 %v1737_v45, %v1737_v45 }
 0x63a   :  { %v3068_v46 = vadd.f32 %v1525_v52, %v1524_v35  ;;  %v1621_v39 = vsel %vm357_vm0, %v1620_v32, %v1618_v30  ;;  %v1736_v52 = vld [vmem:[%s3185_s0 + $0x7] sm:$0x1]  ;;  %v2252_v32 = vld [vmem:[%s3189_s4 + $0x38] sm:$0xff]  }
 0x63b   :  { %v1622_v43 = vpack.c.b16 %v1621_v39, %v1621_v39  ;;  %v1738_v35 = vpack.c.bf16 %v1736_v52, %v1736_v52  ;;  %v1826_v49 = vunpack.c.l.b16 %v1739_v47  ;;  %v2257_v39 = vld [vmem:[%s3189_s4 + $0x10] sm:$0xff]   ;;  %v2153_v52 = vld [vmem:[%s3190_s5] ss:$0 sm:$0xff] }
 0x63c   :  { %2354 = vtanh.f32 %v3068_v46 }
 0x63d   :  { %v1827_v50 = vrot.slane %v1826_v49, 7 }
 0x649   :  { %v2355_v55 = vpop.eup %2354 }
 0x64a   :  { %v1528_v63 = vmul.f32 %v2355_v55, %v2353_v51 }
 0x64c   :  { %v1533_v62 = vpack.c.bf16 %v1528_v63, %v1528_v63  ;;  %v3194_v63 = vmov 0.0  }
 0x64e   :  { %1567 = vmatmul.mubr.bf16.vlgmr.msra.gmra.mxu0 %v1533_v62  ;;  %1608 = vmatmul.mubr.bf16.vlgmr.msra.gmra.mxu1 %v1533_v62  ;;  %v2256_v62 = vld [vmem:[%s3189_s4 + $0x18] sm:$0xff]  }
 0x64f   :  { %1641 = vmatpush1.bf16.msra.mxu0 %v2999_v31  ;;  %1682 = vmatpush1.bf16.msra.mxu1 %v3005_v34 }
 0x650   :  { %1658 = vmatprep.mubr.bf16.mxu0 %v2471_v0  ;;  %1699 = vmatprep.mubr.bf16.mxu1 %v2471_v0 }
 0x651   :  { %1741 = vmatprep.subr.bf16.mxu0 %v2884_v38  ;;  %1782 = vmatprep.subr.bf16.mxu1 %v2887_v41 }
 0x656   :  { %2143 = vmatmul.mubr.msk.bf16.vlgmr.msra.gmra.mxu0 %vm380_vm1, %v1622_v43  ;;  %2144 = vmatmul.mubr.msk.bf16.vlgmr.msra.gmra.mxu1 %vm380_vm1, %v1622_v43  ;;  %v2258_v43 = vld [vmem:[%s3189_s4 + $0x8] sm:$0xff]  }
 0x657   :  { %1742 = vmatpush1.bf16.msra.mxu0 %v2892_v42  ;;  %1783 = vmatpush1.bf16.msra.mxu1 %v2895_v48 }
 0x658   :  { %1743 = vmatprep.subr.bf16.mxu0 %v2898_v3  ;;  %1784 = vmatprep.subr.bf16.mxu1 %v2901_v4 }
 0x659   :  { %1773 = vmatprep.mubr.bf16.mxu0 %v2471_v0  ;;  %1814 = vmatprep.mubr.bf16.mxu1 %v2471_v0 }
 0x65b   :  { %1744 = vmatpush1.bf16.msra.mxu0 %v2906_v5  ;;  %1785 = vmatpush1.bf16.msra.mxu1 %v2909_v6 }
 0x65c   :  { %1745 = vmatprep.subr.bf16.mxu0 %v2912_v7  ;;  %1786 = vmatprep.subr.bf16.mxu1 %v2915_v8 }
 0x65f   :  { %1746 = vmatpush1.bf16.msra.mxu0 %v2918_v9  ;;  %1787 = vmatpush1.bf16.msra.mxu1 %v2921_v10 }
 0x660   :  { %1747 = vmatprep.subr.bf16.mxu0 %v2924_v11  ;;  %1788 = vmatprep.subr.bf16.mxu1 %v2927_v12 }
 0x663   :  { %1748 = vmatpush1.bf16.msra.mxu0 %v2930_v13  ;;  %1789 = vmatpush1.bf16.msra.mxu1 %v2933_v14 }
 0x664   :  { %1749 = vmatprep.subr.bf16.mxu0 %v2936_v15  ;;  %1790 = vmatprep.subr.bf16.mxu1 %v2939_v16 }
 0x667   :  { %1750 = vmatpush1.bf16.msra.mxu0 %v2942_v17  ;;  %1791 = vmatpush1.bf16.msra.mxu1 %v2945_v18 }
 0x668   :  { %1751 = vmatprep.subr.bf16.mxu0 %v2948_v19  ;;  %1792 = vmatprep.subr.bf16.mxu1 %v2951_v20 }
 0x66b   :  { %1752 = vmatpush1.bf16.msra.mxu0 %v2954_v21  ;;  %1793 = vmatpush1.bf16.msra.mxu1 %v2957_v22 }
 0x66c   :  { %1753 = vmatprep.subr.bf16.mxu0 %v2960_v23  ;;  %1794 = vmatprep.subr.bf16.mxu1 %v2963_v24 }
 0x66f   :  { %1754 = vmatpush1.bf16.msra.mxu0 %v2966_v25  ;;  %1795 = vmatpush1.bf16.msra.mxu1 %v2969_v26 }
 0x670   :  { %1755 = vmatprep.subr.bf16.mxu0 %v2972_v27  ;;  %1796 = vmatprep.subr.bf16.mxu1 %v2975_v28 }
 0x673   :  { %1756 = vmatpush1.bf16.msra.mxu0 %v3045_v36  ;;  %1797 = vmatpush1.bf16.msra.mxu1 %v3048_v59 }
 0x674   :  { %1847 = vmatprep.subr.bf16.mxu0 %v3054_v2  ;;  %1888 = vmatprep.subr.bf16.mxu1 %v3060_v29 }
 0x70e   :  { %v1568_v38 = vpop.f32.mrf.mxu0  ;;  %v1609_v41 = vpop.f32.mrf.mxu1 }
 0x710   :  { %v1570_v42 = vpop.f32.mrf.mxu0  ;;  %v1611_v48 = vpop.f32.mrf.mxu1 }
 0x712   :  { %v1572_v3 = vpop.f32.mrf.mxu0  ;;  %v1613_v4 = vpop.f32.mrf.mxu1 }
 0x714   :  { %v1573_v5 = vpop.f32.mrf.mxu0  ;;  %v1614_v6 = vpop.f32.mrf.mxu1 }
 0x716   :  { %v1660_v7 = vpop.f32.mrf.mxu0  ;;  %v1701_v8 = vpop.f32.mrf.mxu1 }
 0x717   :  { %v1661_v9 = vadd.f32 %v1660_v7, %v1568_v38  ;;  %v1702_v23 = vadd.f32 %v1701_v8, %v1609_v41  ;;  %v2259_v38 = vld [vmem:[%s3189_s4] sm:$0xff]  }
 0x718   :  { %v1662_v10 = vpop.f32.mrf.mxu0  ;;  %v1703_v11 = vpop.f32.mrf.mxu1 }
 0x719   :  { %v1708_v12 = vadd.f32 %v1661_v9, %v2687_v61  ;;  %v1663_v13 = vadd.f32 %v1662_v10, %v1570_v42  ;;  %v1704_v21 = vadd.f32 %v1703_v11, %v1611_v48  ;;  %v1710_v26 = vadd.f32 %v1702_v23, %v2696_v56 }
 0x71a   :  { %v1664_v14 = vpop.f32.mrf.mxu0  ;;  %v1705_v15 = vpop.f32.mrf.mxu1 }
 0x71b   :  { %v2145_v16 = vmul.f32 -1.442695, %v1708_v12  ;;  %v1709_v17 = vadd.f32 %v1663_v13, %v2689_v33  ;;  %v1711_v22 = vadd.f32 %v1704_v21, %v2693_v54 }
 0x71c   :  { %v1665_v18 = vpop.f32.mrf.mxu0  ;;  %v1706_v19 = vpop.f32.mrf.mxu1 }
 0x71d   :  { %2356 = vpow2.f32 %v2145_v16  ;;  %v2146_v20 = vmul.f32 -1.442695, %v1709_v17  ;;  %v2147_v24 = vmul.f32 -1.442695, %v1711_v22 }
 0x71f   :  { %2358 = vpow2.f32 %v2146_v20 }
 0x720   :  { %2360 = vpow2.f32 %v2147_v24 }
 0x72a   :  { %v2357_v25 = vpop.eup %2356 }
 0x72b   :  { %v1715_v27 = vadd.f32 1.0, %v2357_v25 }
 0x72c   :  { %v2359_v28 = vpop.eup %2358 }
 0x72d   :  { %2362 = vrcp.f32 %v1715_v27  ;;  %v1721_v36 = vadd.f32 1.0, %v2359_v28  ;;  %v2361_v59 = vpop.eup %2360 }
 0x72e   :  { %2364 = vtanh.f32 %v1710_v26  ;;  %v1728_v37 = vadd.f32 1.0, %v2361_v59 }
 0x72f   :  { %2366 = vrcp.f32 %v1721_v36 }
 0x730   :  { %2368 = vrcp.f32 %v1728_v37 }
 0x73a   :  { %v2363_v2 = vpop.eup %2362 }
 0x73b   :  { %v2365_v29 = vpop.eup %2364 }
 0x73c   :  { %v2367_v57 = vpop.eup %2366  ;;  %v1732_v1 = vmul.f32 %v2365_v29, %v2363_v2 }
 0x73d   :  { %v1731_v40 = vmul.f32 %v2367_v57, %v3068_v46  ;;  %v2369_v58 = vpop.eup %2368  ;;  %v1825_v46 = vunpack.c.l.b16 %v1738_v35 }
 0x73f   :  { %v3125_v53 = vadd.f32 %v1732_v1, %v1731_v40  ;;  %v1828_v55 = vsel %vm357_vm0, %v1827_v50, %v1825_v46 }
 0x740   :  { %v1829_v30 = vpack.c.b16 %v1828_v55, %v1828_v55 }
 0x741   :  { %2370 = vtanh.f32 %v3125_v53 }
 0x74e   :  { %v2371_v44 = vpop.eup %2370 }
 0x74f   :  { %v1735_v60 = vmul.f32 %v2371_v44, %v2369_v58 }
 0x751   :  { %v1740_v51 = vpack.c.bf16 %v1735_v60, %v1735_v60 }
 0x753   :  { %1774 = vmatmul.mubr.bf16.vlgmr.msra.gmra.mxu0 %v1740_v51  ;;  %1815 = vmatmul.mubr.bf16.vlgmr.msra.gmra.mxu1 %v1740_v51 }
 0x754   :  { %1848 = vmatpush1.bf16.msra.mxu0 %v2999_v31  ;;  %1889 = vmatpush1.bf16.msra.mxu1 %v3005_v34  ;;  %v2253_v31 = vld [vmem:[%s3189_s4 + $0x30] sm:$0xff]   ;;  %v2255_v34 = vld [vmem:[%s3189_s4 + $0x20] sm:$0xff]  }
 0x755   :  { %1865 = vmatprep.mubr.bf16.mxu0 %v2471_v0  ;;  %1906 = vmatprep.mubr.bf16.mxu1 %v2471_v0  ;;  %v2254_v0 = vld [vmem:[%s3189_s4 + $0x28] sm:$0xff]  }
 0x756   :  { %2171 = vmatprep.subr.bf16.mxu0 %v3194_v63 }
 0x75b   :  { %2148 = vmatmul.mubr.msk.bf16.vlgmr.msra.gmra.mxu0 %vm380_vm1, %v1829_v30  ;;  %2149 = vmatmul.mubr.msk.bf16.vlgmr.msra.gmra.mxu1 %vm380_vm1, %v1829_v30 }
 0x75c   :  { %2172 = vmatpush3.bf16.msra.mxu0 %v2252_v32  ;;  %2187 = vmatprep.mubr.msk.bf16.mxu0 %vm2473_vm2, %v3194_v63 }
 0x75d   :  { %2173 = vmatprep.subr.bf16.mxu0 %v3194_v63 }
 0x760   :  { %2174 = vmatpush3.bf16.msra.mxu0 %v2253_v31 }
 0x761   :  { %2175 = vmatprep.subr.bf16.mxu0 %v3194_v63 }
 0x764   :  { %2176 = vmatpush3.bf16.msra.mxu0 %v2254_v0 }
 0x765   :  { %2177 = vmatprep.subr.bf16.mxu0 %v3194_v63 }
 0x768   :  { %2178 = vmatpush3.bf16.msra.mxu0 %v2255_v34 }
 0x769   :  { %2179 = vmatprep.subr.bf16.mxu0 %v3194_v63 }
 0x76c   :  { %2180 = vmatpush3.bf16.msra.mxu0 %v2256_v62 }
 0x76d   :  { %2181 = vmatprep.subr.bf16.mxu0 %v3194_v63 }
 0x770   :  { %2182 = vmatpush3.bf16.msra.mxu0 %v2257_v39 }
 0x771   :  { %2183 = vmatprep.subr.bf16.mxu0 %v3194_v63 }
 0x774   :  { %2184 = vmatpush3.bf16.msra.mxu0 %v2258_v43 }
 0x775   :  { %2185 = vmatprep.subr.bf16.mxu0 %v3194_v63 }
 0x778   :  { %2186 = vmatpush3.bf16.msra.mxu0 %v2259_v38 }
 0x813   :  { %v1775_v41 = vpop.f32.mrf.mxu0  ;;  %v1816_v42 = vpop.f32.mrf.mxu1 }
 0x815   :  { %v1777_v48 = vpop.f32.mrf.mxu0  ;;  %v1818_v3 = vpop.f32.mrf.mxu1 }
 0x817   :  { %v1779_v4 = vpop.f32.mrf.mxu0  ;;  %v1820_v5 = vpop.f32.mrf.mxu1 }
 0x819   :  { %v1780_v6 = vpop.f32.mrf.mxu0  ;;  %v1821_v7 = vpop.f32.mrf.mxu1 }
 0x81b   :  { %v1867_v8 = vpop.f32.mrf.mxu0  ;;  %v1908_v9 = vpop.f32.mrf.mxu1 }
 0x81c   :  { %v1868_v10 = vadd.f32 %v1867_v8, %v1775_v41  ;;  %v1909_v24 = vadd.f32 %v1908_v9, %v1816_v42 }
 0x81d   :  { %v1869_v11 = vpop.f32.mrf.mxu0  ;;  %v1910_v12 = vpop.f32.mrf.mxu1 }
 0x81e   :  { %v1915_v13 = vadd.f32 %v1868_v10, %v2687_v61  ;;  %v1870_v14 = vadd.f32 %v1869_v11, %v1777_v48  ;;  %v1911_v22 = vadd.f32 %v1910_v12, %v1818_v3  ;;  %v1917_v27 = vadd.f32 %v1909_v24, %v2696_v56 }
 0x81f   :  { %v1871_v15 = vpop.f32.mrf.mxu0  ;;  %v1912_v16 = vpop.f32.mrf.mxu1 }
 0x820   :  { %v2150_v17 = vmul.f32 -1.442695, %v1915_v13  ;;  %v1916_v18 = vadd.f32 %v1870_v14, %v2689_v33  ;;  %v1918_v23 = vadd.f32 %v1911_v22, %v2693_v54 }
 0x821   :  { %v1872_v19 = vpop.f32.mrf.mxu0  ;;  %v1913_v20 = vpop.f32.mrf.mxu1 }
 0x822   :  { %2372 = vpow2.f32 %v2150_v17  ;;  %v2151_v21 = vmul.f32 -1.442695, %v1916_v18  ;;  %v2152_v25 = vmul.f32 -1.442695, %v1918_v23 }
 0x824   :  { %2374 = vpow2.f32 %v2151_v21 }
 0x825   :  { %2376 = vpow2.f32 %v2152_v25 }
 0x82f   :  { %v2373_v26 = vpop.eup %2372 }
 0x830   :  { %v1922_v61 = vadd.f32 1.0, %v2373_v26 }
 0x831   :  { %v2375_v28 = vpop.eup %2374 }
 0x832   :  { %2378 = vrcp.f32 %v1922_v61  ;;  %v1928_v36 = vadd.f32 1.0, %v2375_v28  ;;  %v2377_v33 = vpop.eup %2376 }
 0x833   :  { %2380 = vtanh.f32 %v1917_v27  ;;  %v1935_v57 = vadd.f32 1.0, %v2377_v33 }
 0x834   :  { %2382 = vrcp.f32 %v1928_v36 }
 0x835   :  { %2384 = vrcp.f32 %v1935_v57 }
 0x83f   :  { %v2379_v59 = vpop.eup %2378 }
 0x840   :  { %v2381_v2 = vpop.eup %2380 }
 0x841   :  { %v2383_v29 = vpop.eup %2382  ;;  %v1939_v37 = vmul.f32 %v2381_v2, %v2379_v59 }
 0x842   :  { %v1938_v54 = vmul.f32 %v2383_v29, %v3125_v53  ;;  %v2385_v56 = vpop.eup %2384 }
 0x844   :  { %v1940_v1 = vadd.f32 %v1939_v37, %v1938_v54 }
 0x846   :  { %1944 = vst [vmem:[#allocation3] sm:$0x3] %v1940_v1  ;;  %2386 = vtanh.f32 %v1940_v1 }
 0x853   :  { %v2387_v40 = vpop.eup %2386 }
 0x854   :  { %v1942_v45 = vmul.f32 %v2387_v40, %v2385_v56 }
 0x856   :  { %1943 = vst [vmem:[#allocation2] sm:$0x3] %v1942_v45  ;;  %v1948_v47 = vpack.c.bf16 %v1942_v45, %v1942_v45 }
 0x858   :  { %2188 = vmatmul.mubr.bf16.vlgmr.msra.gmra.mxu0 %v1948_v47 }
 0x918   :  { %v2054_v35 = vpop.f32.mrf.mxu0 }
 0x919   :  { %v2055_v49 = vadd.f32 %v2153_v52, %v2054_v35 }
 0x91a   :  { %v2189_v53 = vpop.f32.mrf.mxu0 }
 0x91b   :  { %2061 = vst.msk [vmem:[#allocation7] sm:$0x3] %vm2060_vm3, %v2055_v49 }
 0x91c   :  { %v2057_v58 = vpop.f32.mrf.mxu0 }
 0x91d   :  { %2455 = shalt.err (!%p2452_p9)
}
 0x91e   :  { %2071 = dma.vmem_to_hbm [thread:$0]  %s2069_s3, 32, %s3191_s6, [#allocation6]   ;;  %v2190_v44 = vpop.f32.mrf.mxu0 }
 0x91f   :  { %2466 = dma.done.wait [#allocation6], 32  }
 0x920   :  { %2467 = vsyncadd [#allocation6], 4294967264 }
 0x921   :  { %2075 = vsyncpa [#allocation5], 1 }
 0x922   :  { %2076 = vsyncpa [#allocation6], 1 }

</bundles_post_ra>
